<compile_context>
chip_gen: v5e
topology: v5e:2x2
jax: 0.10.0
libtpu: 0.0.40
codegen_flags: <defaults>
</compile_context>

<pallas_src>
import functools

import jax
import jax.numpy as jnp
from jax import lax
from jax.experimental import pallas as pl
from jax.experimental.pallas import tpu as pltpu

EPS = 1e-5  # torch.nn.GroupNorm default eps


def _mish(v):
    return v * jnp.tanh(jax.nn.softplus(v))


# ---------------------------------------------------------------------------
# Fused kernel: one batch element per grid step, everything stays on-chip.
# ---------------------------------------------------------------------------
def _hybrid_resblock_kernel(
        x_ref, te_ref, nte_ref,
        w1t_ref, b1_ref, g1_ref, bt1_ref,
        w2t_ref, b2_ref, g2_ref, bt2_ref,
        wct_ref, wcn_ref, bc_ref,
        wr_ref, br_ref, gmat_ref,
        o_ref, *, cond_predict_scale):
    f32 = jnp.float32

    x = x_ref[0].astype(f32)                      # (Cin, L)  channels x length
    L = x.shape[1]

    # Constant 0/1 shift matrices: (a @ sm)[:, t] = a[:, t-1] (0 at t=0),
    # (a @ sp)[:, t] = a[:, t+1] (0 at t=L-1).  Keeps the k=3 halo handling
    # entirely on the MXU — no padding, no misaligned slices, no relayouts.
    r = lax.broadcasted_iota(jnp.int32, (L, L), 0)
    c = lax.broadcasted_iota(jnp.int32, (L, L), 1)
    sm = jnp.where(c == r + 1, 1.0, 0.0).astype(f32)
    sp = jnp.where(c == r - 1, 1.0, 0.0).astype(f32)

    def conv3(a, wt_ref, b_col):
        # a: (C_in, L); wt_ref: (3, C_out, C_in) tap-major, pre-transposed.
        a_m1 = jnp.dot(a, sm, preferred_element_type=f32)
        a_p1 = jnp.dot(a, sp, preferred_element_type=f32)
        acc = jnp.dot(wt_ref[0], a_m1, preferred_element_type=f32)
        acc = acc + jnp.dot(wt_ref[1], a, preferred_element_type=f32)
        acc = acc + jnp.dot(wt_ref[2], a_p1, preferred_element_type=f32)
        return acc + b_col                        # (C_out, L)

    def group_norm(h, gamma_col, beta_col):
        # h: (C, L); per-(group x L) stats, two-pass (centered) variance.
        mean_c = jnp.mean(h, axis=1, keepdims=True)                   # (C, 1)
        gmean = jnp.dot(gmat_ref[...], mean_c, preferred_element_type=f32)
        d = h - gmean
        var_c = jnp.mean(d * d, axis=1, keepdims=True)                # (C, 1)
        gvar = jnp.dot(gmat_ref[...], var_c, preferred_element_type=f32)
        return d * lax.rsqrt(gvar + EPS) * gamma_col + beta_col

    # ---- blocks[0]: Conv1d -> GroupNorm -> Mish ---------------------------
    h = _mish(group_norm(conv3(x, w1t_ref, b1_ref[...]),
                         g1_ref[...], bt1_ref[...]))                 # (Cout,L)

    # ---- cond encoder: Linear(Mish(cat(time, non_temporal))) --------------
    # cat + Linear is split into two matmuls on the two weight halves.
    e = (jnp.dot(wct_ref[...], _mish(te_ref[0].astype(f32)),
                 preferred_element_type=f32)
         + jnp.dot(wcn_ref[...], _mish(nte_ref[0].astype(f32)),
                   preferred_element_type=f32)
         + bc_ref[...])                                              # (Ce, 1)

    if cond_predict_scale:
        cout = h.shape[0]
        h = e[:cout, :] * h + e[cout:, :]    # FiLM_scale1d: scale * h + bias
    else:
        h = h + e                            # blocks[1](out + embed)

    # ---- blocks[1]: Conv1d -> GroupNorm -> Mish ---------------------------
    h = _mish(group_norm(conv3(h, w2t_ref, b2_ref[...]),
                         g2_ref[...], bt2_ref[...]))                 # (Cout,L)

    # ---- residual 1x1 conv (identity weights when Cin == Cout) ------------
    res = jnp.dot(wr_ref[...], x, preferred_element_type=f32) + br_ref[...]

    o_ref[0] = (h + res).astype(o_ref.dtype)


# ---------------------------------------------------------------------------
# Wrapper
# ---------------------------------------------------------------------------
def hybrid_conditional_resblock1d(x, time_embed, non_temporal_embed, params, *,
                                  n_groups=8, cond_predict_scale=False):
    """Forward of HybridConditionalResBlock1d ('coupled+cat', default cfg)."""
    B, Cin, L = x.shape
    Td = time_embed.shape[1]
    Cout, _, K = params["w1"].shape
    Ce = params["wc"].shape[0]
    assert K == 3 and Cout % n_groups == 0

    f32 = jnp.float32
    x = x.astype(f32)
    te3 = time_embed.astype(f32).reshape(B, Td, 1)    # per-batch column blocks
    nte3 = non_temporal_embed.astype(f32).reshape(B, Td, 1)

    # Parameter plumbing (tiny, folded once by XLA): tap-major transposed conv
    # weights for (Cout, Cin) @ (Cin, L) matmuls, column-shaped per-channel
    # vectors, cond-encoder weight split in two (replaces torch.cat), and the
    # group-averaging matrix used for the GroupNorm statistics.
    col = lambda v: v.astype(f32).reshape(-1, 1)
    w1t = jnp.transpose(params["w1"].astype(f32), (2, 0, 1))   # (3, Cout, Cin)
    w2t = jnp.transpose(params["w2"].astype(f32), (2, 0, 1))   # (3, Cout, Cout)
    wc = params["wc"].astype(f32)
    wct, wcn = wc[:, :Td], wc[:, Td:]                          # (Ce, Td) x 2
    if Cin != Cout:
        wr = params["wr"].astype(f32)[:, :, 0]                 # (Cout, Cin)
        br = col(params["br"])
    else:
        wr = jnp.eye(Cout, dtype=f32)                          # Identity path
        br = jnp.zeros((Cout, 1), f32)
    cpg = Cout // n_groups
    gid = jnp.arange(Cout) // cpg
    gmat = (gid[:, None] == gid[None, :]).astype(f32) / float(cpg)

    per_batch = lambda b: (b, 0, 0)
    bcast2 = lambda b: (0, 0)
    bcast3 = lambda b: (0, 0, 0)

    return pl.pallas_call(
        functools.partial(_hybrid_resblock_kernel,
                          cond_predict_scale=cond_predict_scale),
        out_shape=jax.ShapeDtypeStruct((B, Cout, L), f32),
        grid=(B,),
        in_specs=[
            pl.BlockSpec((1, Cin, L), per_batch),      # x
            pl.BlockSpec((1, Td, 1), per_batch),       # time_embed (column)
            pl.BlockSpec((1, Td, 1), per_batch),       # non_temporal (column)
            pl.BlockSpec((K, Cout, Cin), bcast3),      # conv1 taps
            pl.BlockSpec((Cout, 1), bcast2),           # conv1 bias
            pl.BlockSpec((Cout, 1), bcast2),           # gn1 gamma
            pl.BlockSpec((Cout, 1), bcast2),           # gn1 beta
            pl.BlockSpec((K, Cout, Cout), bcast3),     # conv2 taps
            pl.BlockSpec((Cout, 1), bcast2),           # conv2 bias
            pl.BlockSpec((Cout, 1), bcast2),           # gn2 gamma
            pl.BlockSpec((Cout, 1), bcast2),           # gn2 beta
            pl.BlockSpec((Ce, Td), bcast2),            # cond W (time half)
            pl.BlockSpec((Ce, Td), bcast2),            # cond W (non-temp half)
            pl.BlockSpec((Ce, 1), bcast2),             # cond bias
            pl.BlockSpec((Cout, Cin), bcast2),         # residual 1x1 W / eye
            pl.BlockSpec((Cout, 1), bcast2),           # residual bias / zeros
            pl.BlockSpec((Cout, Cout), bcast2),        # group-average matrix
        ],
        out_specs=pl.BlockSpec((1, Cout, L), per_batch),
        compiler_params=pltpu.CompilerParams(
            dimension_semantics=("parallel",)),
    )(x, te3, nte3,
      w1t, col(params["b1"]), col(params["g1"]), col(params["bt1"]),
      w2t, col(params["b2"]), col(params["g2"]), col(params["bt2"]),
      wct, wcn, col(params["bc"]),
      wr, br, gmat)


# ---------------------------------------------------------------------------
# Parameter init (PyTorch-shaped tensors) and pure-JAX reference.
# ---------------------------------------------------------------------------
def init_params(key, inp_channels, out_channels, time_embed_dim, *,
                cond_predict_scale=False):
    K = 3
    cond_dim = 2 * time_embed_dim              # cond_mode == 'coupled+cat'
    Ce = 2 * out_channels if cond_predict_scale else out_channels
    ks = jax.random.split(key, 12)
    u = lambda k, shape, s: jax.random.uniform(k, shape, jnp.float32, -s, s)
    s1 = 1.0 / (inp_channels * K) ** 0.5
    s2 = 1.0 / (out_channels * K) ** 0.5
    sc = 1.0 / cond_dim ** 0.5
    p = dict(
        w1=u(ks[0], (out_channels, inp_channels, K), s1),
        b1=u(ks[1], (out_channels,), s1),
        g1=1.0 + u(ks[2], (out_channels,), 0.2),
        bt1=u(ks[3], (out_channels,), 0.2),
        w2=u(ks[4], (out_channels, out_channels, K), s2),
        b2=u(ks[5], (out_channels,), s2),
        g2=1.0 + u(ks[6], (out_channels,), 0.2),
        bt2=u(ks[7], (out_channels,), 0.2),
        wc=u(ks[8], (Ce, cond_dim), sc),
        bc=u(ks[9], (Ce,), sc),
    )
    if inp_channels != out_channels:
        sr = 1.0 / inp_channels ** 0.5
        p["wr"] = u(ks[10], (out_channels, inp_channels, 1), sr)
        p["br"] = u(ks[11], (out_channels,), sr)
    return p


def ref_forward(x, time_embed, non_temporal_embed, p, *, n_groups,
                cond_predict_scale):
    f32 = jnp.float32
    x = x.astype(f32)
    B, Cin, L = x.shape
    Cout = p["w1"].shape[0]

    def conv1d(a, w, b):
        ap = jnp.pad(a, ((0, 0), (0, 0), (1, 1)))
        out = sum(jnp.einsum("bcl,oc->bol", ap[:, :, k:k + L], w[:, :, k])
                  for k in range(3))
        return out + b[None, :, None]

    def gn(h, gamma, beta):
        hg = h.reshape(B, n_groups, Cout // n_groups, L)
        mean = hg.mean(axis=(2, 3), keepdims=True)
        var = hg.var(axis=(2, 3), keepdims=True)
        hn = (hg - mean) * lax.rsqrt(var + EPS)
        return (hn.reshape(B, Cout, L) * gamma[None, :, None]
                + beta[None, :, None])

    h = _mish(gn(conv1d(x, p["w1"], p["b1"]), p["g1"], p["bt1"]))
    cond = jnp.concatenate([time_embed, non_temporal_embed], axis=1).astype(f32)
    embed = _mish(cond) @ p["wc"].T + p["bc"]                         # (B, Ce)
    if cond_predict_scale:
        h = embed[:, :Cout, None] * h + embed[:, Cout:, None]
    else:
        h = h + embed[:, :, None]
    out = _mish(gn(conv1d(h, p["w2"], p["b2"]), p["g2"], p["bt2"]))
    if Cin != Cout:
        res = (jnp.einsum("bcl,oc->bol", x, p["wr"][:, :, 0])
               + p["br"][None, :, None])
    else:
        res = x
    return out + res


if __name__ == "__main__":
    B, Cin, Cout, L = 2, 4, 16, 16
    time_embed_dim = 16
    n_groups = 8

    key = jax.random.PRNGKey(0)
    kx, kt, kn, kp0, kp1 = jax.random.split(key, 5)
    x = jax.random.normal(kx, (B, Cin, L), jnp.float32)
    time_embed = jax.random.normal(kt, (B, time_embed_dim), jnp.float32)
    non_temporal_embed = jax.random.normal(kn, (B, time_embed_dim), jnp.float32)

    for cond_predict_scale, kp in ((False, kp0), (True, kp1)):
        params = init_params(kp, Cin, Cout, time_embed_dim,
                             cond_predict_scale=cond_predict_scale)
        out = jax.block_until_ready(hybrid_conditional_resblock1d(
            x, time_embed, non_temporal_embed, params,
            n_groups=n_groups, cond_predict_scale=cond_predict_scale))
        assert out.shape == (B, Cout, L)
        ref = jax.block_until_ready(ref_forward(
            x, time_embed, non_temporal_embed, params,
            n_groups=n_groups, cond_predict_scale=cond_predict_scale))
        err = float(jnp.max(jnp.abs(out - ref)))
        assert jnp.allclose(out, ref, atol=1e-3, rtol=1e-3), (
            f"cond_predict_scale={cond_predict_scale}: max abs diff {err}")

    print("KERNEL_OK")
</pallas_src>

<mosaic_0001>
module attributes {stable_mosaic.version = 11 : i64} {
  func.func @_hybrid_resblock_kernel(%arg0: i32, %arg1: memref<1x4x16xf32, #tpu.memory_space<vmem>>, %arg2: memref<1x16x1xf32, #tpu.memory_space<vmem>>, %arg3: memref<1x16x1xf32, #tpu.memory_space<vmem>>, %arg4: memref<3x16x4xf32, #tpu.memory_space<vmem>>, %arg5: memref<16x1xf32, #tpu.memory_space<vmem>>, %arg6: memref<16x1xf32, #tpu.memory_space<vmem>>, %arg7: memref<16x1xf32, #tpu.memory_space<vmem>>, %arg8: memref<3x16x16xf32, #tpu.memory_space<vmem>>, %arg9: memref<16x1xf32, #tpu.memory_space<vmem>>, %arg10: memref<16x1xf32, #tpu.memory_space<vmem>>, %arg11: memref<16x1xf32, #tpu.memory_space<vmem>>, %arg12: memref<16x16xf32, #tpu.memory_space<vmem>>, %arg13: memref<16x16xf32, #tpu.memory_space<vmem>>, %arg14: memref<16x1xf32, #tpu.memory_space<vmem>>, %arg15: memref<16x4xf32, #tpu.memory_space<vmem>>, %arg16: memref<16x1xf32, #tpu.memory_space<vmem>>, %arg17: memref<16x16xf32, #tpu.memory_space<vmem>>, %arg18: memref<1x16x16xf32, #tpu.memory_space<vmem>>) attributes {dimension_semantics = [#tpu.dimension_semantics<parallel>], iteration_bounds = array<i64: 2>, scalar_prefetch = 0 : i64, scratch_operands = 0 : i64, tpu.core_type = #tpu.core_type<tc>, window_params = [{transform_indices = @transform_0, window_bounds = array<i64: 1, 4, 16>}, {transform_indices = @transform_1, window_bounds = array<i64: 1, 16, 1>}, {transform_indices = @transform_2, window_bounds = array<i64: 1, 16, 1>}, {pipeline_mode = #tpu.pipeline_mode<synchronous>, transform_indices = @transform_3, window_bounds = array<i64: 3, 16, 4>}, {pipeline_mode = #tpu.pipeline_mode<synchronous>, transform_indices = @transform_4, window_bounds = array<i64: 16, 1>}, {pipeline_mode = #tpu.pipeline_mode<synchronous>, transform_indices = @transform_5, window_bounds = array<i64: 16, 1>}, {pipeline_mode = #tpu.pipeline_mode<synchronous>, transform_indices = @transform_6, window_bounds = array<i64: 16, 1>}, {pipeline_mode = #tpu.pipeline_mode<synchronous>, transform_indices = @transform_7, window_bounds = array<i64: 3, 16, 16>}, {pipeline_mode = #tpu.pipeline_mode<synchronous>, transform_indices = @transform_8, window_bounds = array<i64: 16, 1>}, {pipeline_mode = #tpu.pipeline_mode<synchronous>, transform_indices = @transform_9, window_bounds = array<i64: 16, 1>}, {pipeline_mode = #tpu.pipeline_mode<synchronous>, transform_indices = @transform_10, window_bounds = array<i64: 16, 1>}, {pipeline_mode = #tpu.pipeline_mode<synchronous>, transform_indices = @transform_11, window_bounds = array<i64: 16, 16>}, {pipeline_mode = #tpu.pipeline_mode<synchronous>, transform_indices = @transform_12, window_bounds = array<i64: 16, 16>}, {pipeline_mode = #tpu.pipeline_mode<synchronous>, transform_indices = @transform_13, window_bounds = array<i64: 16, 1>}, {pipeline_mode = #tpu.pipeline_mode<synchronous>, transform_indices = @transform_14, window_bounds = array<i64: 16, 4>}, {pipeline_mode = #tpu.pipeline_mode<synchronous>, transform_indices = @transform_15, window_bounds = array<i64: 16, 1>}, {pipeline_mode = #tpu.pipeline_mode<synchronous>, transform_indices = @transform_16, window_bounds = array<i64: 16, 16>}, {transform_indices = @transform_17, window_bounds = array<i64: 1, 16, 16>}]} {
    %c0 = arith.constant 0 : index
    %c0_0 = arith.constant 0 : index
    %c0_1 = arith.constant 0 : index
    %0 = vector.load %arg1[%c0, %c0_0, %c0_1] : memref<1x4x16xf32, #tpu.memory_space<vmem>>, vector<1x4x16xf32>
    %1 = vector.shape_cast %0 : vector<1x4x16xf32> to vector<4x16xf32>
    %2 = tpu.iota {dimensions = array<i32: 0>} : vector<16x16xi32>
    %3 = tpu.iota {dimensions = array<i32: 1>} : vector<16x16xi32>
    %c1_i32 = arith.constant 1 : i32
    %4 = vector.broadcast %c1_i32 : i32 to vector<16x16xi32>
    %5 = arith.addi %2, %4 : vector<16x16xi32>
    %6 = arith.cmpi eq, %3, %5 : vector<16x16xi32>
    %cst = arith.constant 1.000000e+00 : f32
    %cst_2 = arith.constant 0.000000e+00 : f32
    %7 = vector.broadcast %cst : f32 to vector<16x16xf32>
    %8 = vector.broadcast %cst_2 : f32 to vector<16x16xf32>
    %9 = arith.select %6, %7, %8 : vector<16x16xi1>, vector<16x16xf32>
    %c1_i32_3 = arith.constant 1 : i32
    %10 = vector.broadcast %c1_i32_3 : i32 to vector<16x16xi32>
    %11 = arith.subi %2, %10 : vector<16x16xi32>
    %12 = arith.cmpi eq, %3, %11 : vector<16x16xi32>
    %cst_4 = arith.constant 1.000000e+00 : f32
    %cst_5 = arith.constant 0.000000e+00 : f32
    %13 = vector.broadcast %cst_4 : f32 to vector<16x16xf32>
    %14 = vector.broadcast %cst_5 : f32 to vector<16x16xf32>
    %15 = arith.select %12, %13, %14 : vector<16x16xi1>, vector<16x16xf32>
    %c0_6 = arith.constant 0 : index
    %c0_7 = arith.constant 0 : index
    %16 = vector.load %arg5[%c0_6, %c0_7] : memref<16x1xf32, #tpu.memory_space<vmem>>, vector<16x1xf32>
    %cst_8 = arith.constant dense<0.000000e+00> : vector<4x16xf32>
    %17 = tpu.matmul %1, %9, %cst_8 {dimension_numbers = #tpu.dot_dimension_numbers<[1], [0], [0], [1], [0, 0, 1, 1], [], []>} : vector<4x16xf32>, vector<16x16xf32>, vector<4x16xf32> -> vector<4x16xf32>
    %cst_9 = arith.constant dense<0.000000e+00> : vector<4x16xf32>
    %18 = tpu.matmul %1, %15, %cst_9 {dimension_numbers = #tpu.dot_dimension_numbers<[1], [0], [0], [1], [0, 0, 1, 1], [], []>} : vector<4x16xf32>, vector<16x16xf32>, vector<4x16xf32> -> vector<4x16xf32>
    %c0_10 = arith.constant 0 : index
    %c0_11 = arith.constant 0 : index
    %c0_12 = arith.constant 0 : index
    %19 = vector.load %arg4[%c0_10, %c0_11, %c0_12] : memref<3x16x4xf32, #tpu.memory_space<vmem>>, vector<1x16x4xf32>
    %20 = vector.shape_cast %19 : vector<1x16x4xf32> to vector<16x4xf32>
    %cst_13 = arith.constant dense<0.000000e+00> : vector<16x16xf32>
    %21 = tpu.matmul %20, %17, %cst_13 {dimension_numbers = #tpu.dot_dimension_numbers<[1], [0], [0], [1], [0, 0, 1, 1], [], []>} : vector<16x4xf32>, vector<4x16xf32>, vector<16x16xf32> -> vector<16x16xf32>
    %c1 = arith.constant 1 : index
    %c0_14 = arith.constant 0 : index
    %c0_15 = arith.constant 0 : index
    %22 = vector.load %arg4[%c1, %c0_14, %c0_15] : memref<3x16x4xf32, #tpu.memory_space<vmem>>, vector<1x16x4xf32>
    %23 = vector.shape_cast %22 : vector<1x16x4xf32> to vector<16x4xf32>
    %cst_16 = arith.constant dense<0.000000e+00> : vector<16x16xf32>
    %24 = tpu.matmul %23, %1, %cst_16 {dimension_numbers = #tpu.dot_dimension_numbers<[1], [0], [0], [1], [0, 0, 1, 1], [], []>} : vector<16x4xf32>, vector<4x16xf32>, vector<16x16xf32> -> vector<16x16xf32>
    %25 = arith.addf %21, %24 : vector<16x16xf32>
    %c2 = arith.constant 2 : index
    %c0_17 = arith.constant 0 : index
    %c0_18 = arith.constant 0 : index
    %26 = vector.load %arg4[%c2, %c0_17, %c0_18] : memref<3x16x4xf32, #tpu.memory_space<vmem>>, vector<1x16x4xf32>
    %27 = vector.shape_cast %26 : vector<1x16x4xf32> to vector<16x4xf32>
    %cst_19 = arith.constant dense<0.000000e+00> : vector<16x16xf32>
    %28 = tpu.matmul %27, %18, %cst_19 {dimension_numbers = #tpu.dot_dimension_numbers<[1], [0], [0], [1], [0, 0, 1, 1], [], []>} : vector<16x4xf32>, vector<4x16xf32>, vector<16x16xf32> -> vector<16x16xf32>
    %29 = arith.addf %25, %28 : vector<16x16xf32>
    %30 = vector.broadcast %16 : vector<16x1xf32> to vector<16x16xf32>
    %31 = arith.addf %29, %30 : vector<16x16xf32>
    %c0_20 = arith.constant 0 : index
    %c0_21 = arith.constant 0 : index
    %32 = vector.load %arg6[%c0_20, %c0_21] : memref<16x1xf32, #tpu.memory_space<vmem>>, vector<16x1xf32>
    %c0_22 = arith.constant 0 : index
    %c0_23 = arith.constant 0 : index
    %33 = vector.load %arg7[%c0_22, %c0_23] : memref<16x1xf32, #tpu.memory_space<vmem>>, vector<16x1xf32>
    %cst_24 = arith.constant dense<0.000000e+00> : vector<16xf32>
    %34 = vector.multi_reduction <add>, %31, %cst_24 [1] : vector<16x16xf32> to vector<16xf32>
    %35 = vector.shape_cast %34 : vector<16xf32> to vector<16x1xf32>
    %cst_25 = arith.constant 1.600000e+01 : f32
    %36 = vector.broadcast %cst_25 : f32 to vector<16x1xf32>
    %37 = arith.divf %35, %36 : vector<16x1xf32>
    %c0_26 = arith.constant 0 : index
    %c0_27 = arith.constant 0 : index
    %38 = vector.load %arg17[%c0_26, %c0_27] : memref<16x16xf32, #tpu.memory_space<vmem>>, vector<16x16xf32>
    %cst_28 = arith.constant dense<0.000000e+00> : vector<16x1xf32>
    %39 = tpu.matmul %38, %37, %cst_28 {dimension_numbers = #tpu.dot_dimension_numbers<[1], [0], [0], [1], [0, 0, 1, 1], [], []>} : vector<16x16xf32>, vector<16x1xf32>, vector<16x1xf32> -> vector<16x1xf32>
    %40 = vector.broadcast %39 : vector<16x1xf32> to vector<16x16xf32>
    %41 = arith.subf %31, %40 : vector<16x16xf32>
    %42 = arith.mulf %41, %41 : vector<16x16xf32>
    %cst_29 = arith.constant dense<0.000000e+00> : vector<16xf32>
    %43 = vector.multi_reduction <add>, %42, %cst_29 [1] : vector<16x16xf32> to vector<16xf32>
    %44 = vector.shape_cast %43 : vector<16xf32> to vector<16x1xf32>
    %cst_30 = arith.constant 1.600000e+01 : f32
    %45 = vector.broadcast %cst_30 : f32 to vector<16x1xf32>
    %46 = arith.divf %44, %45 : vector<16x1xf32>
    %c0_31 = arith.constant 0 : index
    %c0_32 = arith.constant 0 : index
    %47 = vector.load %arg17[%c0_31, %c0_32] : memref<16x16xf32, #tpu.memory_space<vmem>>, vector<16x16xf32>
    %cst_33 = arith.constant dense<0.000000e+00> : vector<16x1xf32>
    %48 = tpu.matmul %47, %46, %cst_33 {dimension_numbers = #tpu.dot_dimension_numbers<[1], [0], [0], [1], [0, 0, 1, 1], [], []>} : vector<16x16xf32>, vector<16x1xf32>, vector<16x1xf32> -> vector<16x1xf32>
    %cst_34 = arith.constant 9.99999974E-6 : f32
    %49 = vector.broadcast %cst_34 : f32 to vector<16x1xf32>
    %50 = arith.addf %48, %49 : vector<16x1xf32>
    %51 = math.rsqrt %50 : vector<16x1xf32>
    %52 = vector.broadcast %51 : vector<16x1xf32> to vector<16x16xf32>
    %53 = arith.mulf %41, %52 : vector<16x16xf32>
    %54 = vector.broadcast %32 : vector<16x1xf32> to vector<16x16xf32>
    %55 = arith.mulf %53, %54 : vector<16x16xf32>
    %56 = vector.broadcast %33 : vector<16x1xf32> to vector<16x16xf32>
    %57 = arith.addf %55, %56 : vector<16x16xf32>
    %cst_35 = arith.constant 0.000000e+00 : f32
    %58 = vector.broadcast %cst_35 : f32 to vector<16x16xf32>
    %59 = arith.maximumf %57, %58 : vector<16x16xf32>
    %60 = vector.broadcast %cst_35 : f32 to vector<16x16xf32>
    %61 = arith.subf %57, %60 : vector<16x16xf32>
    %62 = arith.cmpf one, %61, %61 : vector<16x16xf32>
    %63 = vector.broadcast %cst_35 : f32 to vector<16x16xf32>
    %64 = arith.addf %57, %63 : vector<16x16xf32>
    %65 = math.absf %61 : vector<16x16xf32>
    %cst_36 = arith.constant 0.000000e+00 : f32
    %66 = vector.broadcast %cst_36 : f32 to vector<16x16xf32>
    %67 = arith.subf %66, %65 : vector<16x16xf32>
    %68 = math.exp %67 : vector<16x16xf32>
    %69 = math.log1p %68 : vector<16x16xf32>
    %70 = arith.addf %59, %69 : vector<16x16xf32>
    %71 = arith.select %62, %64, %70 : vector<16x16xi1>, vector<16x16xf32>
    %72 = math.tanh %71 : vector<16x16xf32>
    %73 = arith.mulf %57, %72 : vector<16x16xf32>
    %c0_37 = arith.constant 0 : index
    %c0_38 = arith.constant 0 : index
    %74 = vector.load %arg12[%c0_37, %c0_38] : memref<16x16xf32, #tpu.memory_space<vmem>>, vector<16x16xf32>
    %c0_39 = arith.constant 0 : index
    %c0_40 = arith.constant 0 : index
    %c0_41 = arith.constant 0 : index
    %75 = vector.load %arg2[%c0_39, %c0_40, %c0_41] : memref<1x16x1xf32, #tpu.memory_space<vmem>>, vector<1x16x1xf32>
    %76 = vector.shape_cast %75 : vector<1x16x1xf32> to vector<16x1xf32>
    %cst_42 = arith.constant 0.000000e+00 : f32
    %77 = vector.broadcast %cst_42 : f32 to vector<16x1xf32>
    %78 = arith.maximumf %76, %77 : vector<16x1xf32>
    %79 = vector.broadcast %cst_42 : f32 to vector<16x1xf32>
    %80 = arith.subf %76, %79 : vector<16x1xf32>
    %81 = arith.cmpf one, %80, %80 : vector<16x1xf32>
    %82 = vector.broadcast %cst_42 : f32 to vector<16x1xf32>
    %83 = arith.addf %76, %82 : vector<16x1xf32>
    %84 = math.absf %80 : vector<16x1xf32>
    %cst_43 = arith.constant 0.000000e+00 : f32
    %85 = vector.broadcast %cst_43 : f32 to vector<16x1xf32>
    %86 = arith.subf %85, %84 : vector<16x1xf32>
    %87 = math.exp %86 : vector<16x1xf32>
    %88 = math.log1p %87 : vector<16x1xf32>
    %89 = arith.addf %78, %88 : vector<16x1xf32>
    %90 = arith.select %81, %83, %89 : vector<16x1xi1>, vector<16x1xf32>
    %91 = math.tanh %90 : vector<16x1xf32>
    %92 = arith.mulf %76, %91 : vector<16x1xf32>
    %cst_44 = arith.constant dense<0.000000e+00> : vector<16x1xf32>
    %93 = tpu.matmul %74, %92, %cst_44 {dimension_numbers = #tpu.dot_dimension_numbers<[1], [0], [0], [1], [0, 0, 1, 1], [], []>} : vector<16x16xf32>, vector<16x1xf32>, vector<16x1xf32> -> vector<16x1xf32>
    %c0_45 = arith.constant 0 : index
    %c0_46 = arith.constant 0 : index
    %94 = vector.load %arg13[%c0_45, %c0_46] : memref<16x16xf32, #tpu.memory_space<vmem>>, vector<16x16xf32>
    %c0_47 = arith.constant 0 : index
    %c0_48 = arith.constant 0 : index
    %c0_49 = arith.constant 0 : index
    %95 = vector.load %arg3[%c0_47, %c0_48, %c0_49] : memref<1x16x1xf32, #tpu.memory_space<vmem>>, vector<1x16x1xf32>
    %96 = vector.shape_cast %95 : vector<1x16x1xf32> to vector<16x1xf32>
    %cst_50 = arith.constant 0.000000e+00 : f32
    %97 = vector.broadcast %cst_50 : f32 to vector<16x1xf32>
    %98 = arith.maximumf %96, %97 : vector<16x1xf32>
    %99 = vector.broadcast %cst_50 : f32 to vector<16x1xf32>
    %100 = arith.subf %96, %99 : vector<16x1xf32>
    %101 = arith.cmpf one, %100, %100 : vector<16x1xf32>
    %102 = vector.broadcast %cst_50 : f32 to vector<16x1xf32>
    %103 = arith.addf %96, %102 : vector<16x1xf32>
    %104 = math.absf %100 : vector<16x1xf32>
    %cst_51 = arith.constant 0.000000e+00 : f32
    %105 = vector.broadcast %cst_51 : f32 to vector<16x1xf32>
    %106 = arith.subf %105, %104 : vector<16x1xf32>
    %107 = math.exp %106 : vector<16x1xf32>
    %108 = math.log1p %107 : vector<16x1xf32>
    %109 = arith.addf %98, %108 : vector<16x1xf32>
    %110 = arith.select %101, %103, %109 : vector<16x1xi1>, vector<16x1xf32>
    %111 = math.tanh %110 : vector<16x1xf32>
    %112 = arith.mulf %96, %111 : vector<16x1xf32>
    %cst_52 = arith.constant dense<0.000000e+00> : vector<16x1xf32>
    %113 = tpu.matmul %94, %112, %cst_52 {dimension_numbers = #tpu.dot_dimension_numbers<[1], [0], [0], [1], [0, 0, 1, 1], [], []>} : vector<16x16xf32>, vector<16x1xf32>, vector<16x1xf32> -> vector<16x1xf32>
    %114 = arith.addf %93, %113 : vector<16x1xf32>
    %c0_53 = arith.constant 0 : index
    %c0_54 = arith.constant 0 : index
    %115 = vector.load %arg14[%c0_53, %c0_54] : memref<16x1xf32, #tpu.memory_space<vmem>>, vector<16x1xf32>
    %116 = arith.addf %114, %115 : vector<16x1xf32>
    %117 = vector.broadcast %116 : vector<16x1xf32> to vector<16x16xf32>
    %118 = arith.addf %73, %117 : vector<16x16xf32>
    %c0_55 = arith.constant 0 : index
    %c0_56 = arith.constant 0 : index
    %119 = vector.load %arg9[%c0_55, %c0_56] : memref<16x1xf32, #tpu.memory_space<vmem>>, vector<16x1xf32>
    %cst_57 = arith.constant dense<0.000000e+00> : vector<16x16xf32>
    %120 = tpu.matmul %118, %9, %cst_57 {dimension_numbers = #tpu.dot_dimension_numbers<[1], [0], [0], [1], [0, 0, 1, 1], [], []>} : vector<16x16xf32>, vector<16x16xf32>, vector<16x16xf32> -> vector<16x16xf32>
    %cst_58 = arith.constant dense<0.000000e+00> : vector<16x16xf32>
    %121 = tpu.matmul %118, %15, %cst_58 {dimension_numbers = #tpu.dot_dimension_numbers<[1], [0], [0], [1], [0, 0, 1, 1], [], []>} : vector<16x16xf32>, vector<16x16xf32>, vector<16x16xf32> -> vector<16x16xf32>
    %c0_59 = arith.constant 0 : index
    %c0_60 = arith.constant 0 : index
    %c0_61 = arith.constant 0 : index
    %122 = vector.load %arg8[%c0_59, %c0_60, %c0_61] : memref<3x16x16xf32, #tpu.memory_space<vmem>>, vector<1x16x16xf32>
    %123 = vector.shape_cast %122 : vector<1x16x16xf32> to vector<16x16xf32>
    %cst_62 = arith.constant dense<0.000000e+00> : vector<16x16xf32>
    %124 = tpu.matmul %123, %120, %cst_62 {dimension_numbers = #tpu.dot_dimension_numbers<[1], [0], [0], [1], [0, 0, 1, 1], [], []>} : vector<16x16xf32>, vector<16x16xf32>, vector<16x16xf32> -> vector<16x16xf32>
    %c1_63 = arith.constant 1 : index
    %c0_64 = arith.constant 0 : index
    %c0_65 = arith.constant 0 : index
    %125 = vector.load %arg8[%c1_63, %c0_64, %c0_65] : memref<3x16x16xf32, #tpu.memory_space<vmem>>, vector<1x16x16xf32>
    %126 = vector.shape_cast %125 : vector<1x16x16xf32> to vector<16x16xf32>
    %cst_66 = arith.constant dense<0.000000e+00> : vector<16x16xf32>
    %127 = tpu.matmul %126, %118, %cst_66 {dimension_numbers = #tpu.dot_dimension_numbers<[1], [0], [0], [1], [0, 0, 1, 1], [], []>} : vector<16x16xf32>, vector<16x16xf32>, vector<16x16xf32> -> vector<16x16xf32>
    %128 = arith.addf %124, %127 : vector<16x16xf32>
    %c2_67 = arith.constant 2 : index
    %c0_68 = arith.constant 0 : index
    %c0_69 = arith.constant 0 : index
    %129 = vector.load %arg8[%c2_67, %c0_68, %c0_69] : memref<3x16x16xf32, #tpu.memory_space<vmem>>, vector<1x16x16xf32>
    %130 = vector.shape_cast %129 : vector<1x16x16xf32> to vector<16x16xf32>
    %cst_70 = arith.constant dense<0.000000e+00> : vector<16x16xf32>
    %131 = tpu.matmul %130, %121, %cst_70 {dimension_numbers = #tpu.dot_dimension_numbers<[1], [0], [0], [1], [0, 0, 1, 1], [], []>} : vector<16x16xf32>, vector<16x16xf32>, vector<16x16xf32> -> vector<16x16xf32>
    %132 = arith.addf %128, %131 : vector<16x16xf32>
    %133 = vector.broadcast %119 : vector<16x1xf32> to vector<16x16xf32>
    %134 = arith.addf %132, %133 : vector<16x16xf32>
    %c0_71 = arith.constant 0 : index
    %c0_72 = arith.constant 0 : index
    %135 = vector.load %arg10[%c0_71, %c0_72] : memref<16x1xf32, #tpu.memory_space<vmem>>, vector<16x1xf32>
    %c0_73 = arith.constant 0 : index
    %c0_74 = arith.constant 0 : index
    %136 = vector.load %arg11[%c0_73, %c0_74] : memref<16x1xf32, #tpu.memory_space<vmem>>, vector<16x1xf32>
    %cst_75 = arith.constant dense<0.000000e+00> : vector<16xf32>
    %137 = vector.multi_reduction <add>, %134, %cst_75 [1] : vector<16x16xf32> to vector<16xf32>
    %138 = vector.shape_cast %137 : vector<16xf32> to vector<16x1xf32>
    %cst_76 = arith.constant 1.600000e+01 : f32
    %139 = vector.broadcast %cst_76 : f32 to vector<16x1xf32>
    %140 = arith.divf %138, %139 : vector<16x1xf32>
    %c0_77 = arith.constant 0 : index
    %c0_78 = arith.constant 0 : index
    %141 = vector.load %arg17[%c0_77, %c0_78] : memref<16x16xf32, #tpu.memory_space<vmem>>, vector<16x16xf32>
    %cst_79 = arith.constant dense<0.000000e+00> : vector<16x1xf32>
    %142 = tpu.matmul %141, %140, %cst_79 {dimension_numbers = #tpu.dot_dimension_numbers<[1], [0], [0], [1], [0, 0, 1, 1], [], []>} : vector<16x16xf32>, vector<16x1xf32>, vector<16x1xf32> -> vector<16x1xf32>
    %143 = vector.broadcast %142 : vector<16x1xf32> to vector<16x16xf32>
    %144 = arith.subf %134, %143 : vector<16x16xf32>
    %145 = arith.mulf %144, %144 : vector<16x16xf32>
    %cst_80 = arith.constant dense<0.000000e+00> : vector<16xf32>
    %146 = vector.multi_reduction <add>, %145, %cst_80 [1] : vector<16x16xf32> to vector<16xf32>
    %147 = vector.shape_cast %146 : vector<16xf32> to vector<16x1xf32>
    %cst_81 = arith.constant 1.600000e+01 : f32
    %148 = vector.broadcast %cst_81 : f32 to vector<16x1xf32>
    %149 = arith.divf %147, %148 : vector<16x1xf32>
    %c0_82 = arith.constant 0 : index
    %c0_83 = arith.constant 0 : index
    %150 = vector.load %arg17[%c0_82, %c0_83] : memref<16x16xf32, #tpu.memory_space<vmem>>, vector<16x16xf32>
    %cst_84 = arith.constant dense<0.000000e+00> : vector<16x1xf32>
    %151 = tpu.matmul %150, %149, %cst_84 {dimension_numbers = #tpu.dot_dimension_numbers<[1], [0], [0], [1], [0, 0, 1, 1], [], []>} : vector<16x16xf32>, vector<16x1xf32>, vector<16x1xf32> -> vector<16x1xf32>
    %cst_85 = arith.constant 9.99999974E-6 : f32
    %152 = vector.broadcast %cst_85 : f32 to vector<16x1xf32>
    %153 = arith.addf %151, %152 : vector<16x1xf32>
    %154 = math.rsqrt %153 : vector<16x1xf32>
    %155 = vector.broadcast %154 : vector<16x1xf32> to vector<16x16xf32>
    %156 = arith.mulf %144, %155 : vector<16x16xf32>
    %157 = vector.broadcast %135 : vector<16x1xf32> to vector<16x16xf32>
    %158 = arith.mulf %156, %157 : vector<16x16xf32>
    %159 = vector.broadcast %136 : vector<16x1xf32> to vector<16x16xf32>
    %160 = arith.addf %158, %159 : vector<16x16xf32>
    %cst_86 = arith.constant 0.000000e+00 : f32
    %161 = vector.broadcast %cst_86 : f32 to vector<16x16xf32>
    %162 = arith.maximumf %160, %161 : vector<16x16xf32>
    %163 = vector.broadcast %cst_86 : f32 to vector<16x16xf32>
    %164 = arith.subf %160, %163 : vector<16x16xf32>
    %165 = arith.cmpf one, %164, %164 : vector<16x16xf32>
    %166 = vector.broadcast %cst_86 : f32 to vector<16x16xf32>
    %167 = arith.addf %160, %166 : vector<16x16xf32>
    %168 = math.absf %164 : vector<16x16xf32>
    %cst_87 = arith.constant 0.000000e+00 : f32
    %169 = vector.broadcast %cst_87 : f32 to vector<16x16xf32>
    %170 = arith.subf %169, %168 : vector<16x16xf32>
    %171 = math.exp %170 : vector<16x16xf32>
    %172 = math.log1p %171 : vector<16x16xf32>
    %173 = arith.addf %162, %172 : vector<16x16xf32>
    %174 = arith.select %165, %167, %173 : vector<16x16xi1>, vector<16x16xf32>
    %175 = math.tanh %174 : vector<16x16xf32>
    %176 = arith.mulf %160, %175 : vector<16x16xf32>
    %c0_88 = arith.constant 0 : index
    %c0_89 = arith.constant 0 : index
    %177 = vector.load %arg15[%c0_88, %c0_89] : memref<16x4xf32, #tpu.memory_space<vmem>>, vector<16x4xf32>
    %cst_90 = arith.constant dense<0.000000e+00> : vector<16x16xf32>
    %178 = tpu.matmul %177, %1, %cst_90 {dimension_numbers = #tpu.dot_dimension_numbers<[1], [0], [0], [1], [0, 0, 1, 1], [], []>} : vector<16x4xf32>, vector<4x16xf32>, vector<16x16xf32> -> vector<16x16xf32>
    %c0_91 = arith.constant 0 : index
    %c0_92 = arith.constant 0 : index
    %179 = vector.load %arg16[%c0_91, %c0_92] : memref<16x1xf32, #tpu.memory_space<vmem>>, vector<16x1xf32>
    %180 = vector.broadcast %179 : vector<16x1xf32> to vector<16x16xf32>
    %181 = arith.addf %178, %180 : vector<16x16xf32>
    %182 = arith.addf %176, %181 : vector<16x16xf32>
    %c0_93 = arith.constant 0 : index
    %c0_94 = arith.constant 0 : index
    %c0_95 = arith.constant 0 : index
    %183 = vector.load %arg18[%c0_93, %c0_94, %c0_95] : memref<1x16x16xf32, #tpu.memory_space<vmem>>, vector<1x16x16xf32>
    %184 = vector.shape_cast %183 : vector<1x16x16xf32> to vector<16x16xf32>
    %185 = vector.shape_cast %182 : vector<16x16xf32> to vector<1x16x16xf32>
    tpu.vector_store %arg18[%c0_93, %c0_94, %c0_95], %185 {strides = array<i32>} : memref<1x16x16xf32, #tpu.memory_space<vmem>>, vector<1x16x16xf32>,
    return
  }
  func.func @transform_0(%arg0: i32) -> (i32, i32, i32) {
    %c0_i32 = arith.constant 0 : i32
    %c0_i32_0 = arith.constant 0 : i32
    %c0_i32_1 = arith.constant 0 : i32
    return %arg0, %c0_i32, %c0_i32_0 : i32, i32, i32
  }
  func.func @transform_1(%arg0: i32) -> (i32, i32, i32) {
    %c0_i32 = arith.constant 0 : i32
    %c0_i32_0 = arith.constant 0 : i32
    %c0_i32_1 = arith.constant 0 : i32
    return %arg0, %c0_i32, %c0_i32_0 : i32, i32, i32
  }
  func.func @transform_2(%arg0: i32) -> (i32, i32, i32) {
    %c0_i32 = arith.constant 0 : i32
    %c0_i32_0 = arith.constant 0 : i32
    %c0_i32_1 = arith.constant 0 : i32
    return %arg0, %c0_i32, %c0_i32_0 : i32, i32, i32
  }
  func.func @transform_3(%arg0: i32) -> (i32, i32, i32) {
    %c0_i32 = arith.constant 0 : i32
    %c0_i32_0 = arith.constant 0 : i32
    %c0_i32_1 = arith.constant 0 : i32
    %c0_i32_2 = arith.constant 0 : i32
    return %c0_i32, %c0_i32_0, %c0_i32_1 : i32, i32, i32
  }
  func.func @transform_4(%arg0: i32) -> (i32, i32) {
    %c0_i32 = arith.constant 0 : i32
    %c0_i32_0 = arith.constant 0 : i32
    %c0_i32_1 = arith.constant 0 : i32
    return %c0_i32, %c0_i32_0 : i32, i32
  }
  func.func @transform_5(%arg0: i32) -> (i32, i32) {
    %c0_i32 = arith.constant 0 : i32
    %c0_i32_0 = arith.constant 0 : i32
    %c0_i32_1 = arith.constant 0 : i32
    return %c0_i32, %c0_i32_0 : i32, i32
  }
  func.func @transform_6(%arg0: i32) -> (i32, i32) {
    %c0_i32 = arith.constant 0 : i32
    %c0_i32_0 = arith.constant 0 : i32
    %c0_i32_1 = arith.constant 0 : i32
    return %c0_i32, %c0_i32_0 : i32, i32
  }
  func.func @transform_7(%arg0: i32) -> (i32, i32, i32) {
    %c0_i32 = arith.constant 0 : i32
    %c0_i32_0 = arith.constant 0 : i32
    %c0_i32_1 = arith.constant 0 : i32
    %c0_i32_2 = arith.constant 0 : i32
    return %c0_i32, %c0_i32_0, %c0_i32_1 : i32, i32, i32
  }
  func.func @transform_8(%arg0: i32) -> (i32, i32) {
    %c0_i32 = arith.constant 0 : i32
    %c0_i32_0 = arith.constant 0 : i32
    %c0_i32_1 = arith.constant 0 : i32
    return %c0_i32, %c0_i32_0 : i32, i32
  }
  func.func @transform_9(%arg0: i32) -> (i32, i32) {
    %c0_i32 = arith.constant 0 : i32
    %c0_i32_0 = arith.constant 0 : i32
    %c0_i32_1 = arith.constant 0 : i32
    return %c0_i32, %c0_i32_0 : i32, i32
  }
  func.func @transform_10(%arg0: i32) -> (i32, i32) {
    %c0_i32 = arith.constant 0 : i32
    %c0_i32_0 = arith.constant 0 : i32
    %c0_i32_1 = arith.constant 0 : i32
    return %c0_i32, %c0_i32_0 : i32, i32
  }
  func.func @transform_11(%arg0: i32) -> (i32, i32) {
    %c0_i32 = arith.constant 0 : i32
    %c0_i32_0 = arith.constant 0 : i32
    %c0_i32_1 = arith.constant 0 : i32
    return %c0_i32, %c0_i32_0 : i32, i32
  }
  func.func @transform_12(%arg0: i32) -> (i32, i32) {
    %c0_i32 = arith.constant 0 : i32
    %c0_i32_0 = arith.constant 0 : i32
    %c0_i32_1 = arith.constant 0 : i32
    return %c0_i32, %c0_i32_0 : i32, i32
  }
  func.func @transform_13(%arg0: i32) -> (i32, i32) {
    %c0_i32 = arith.constant 0 : i32
    %c0_i32_0 = arith.constant 0 : i32
    %c0_i32_1 = arith.constant 0 : i32
    return %c0_i32, %c0_i32_0 : i32, i32
  }
  func.func @transform_14(%arg0: i32) -> (i32, i32) {
    %c0_i32 = arith.constant 0 : i32
    %c0_i32_0 = arith.constant 0 : i32
    %c0_i32_1 = arith.constant 0 : i32
    return %c0_i32, %c0_i32_0 : i32, i32
  }
  func.func @transform_15(%arg0: i32) -> (i32, i32) {
    %c0_i32 = arith.constant 0 : i32
    %c0_i32_0 = arith.constant 0 : i32
    %c0_i32_1 = arith.constant 0 : i32
    return %c0_i32, %c0_i32_0 : i32, i32
  }
  func.func @transform_16(%arg0: i32) -> (i32, i32) {
    %c0_i32 = arith.constant 0 : i32
    %c0_i32_0 = arith.constant 0 : i32
    %c0_i32_1 = arith.constant 0 : i32
    return %c0_i32, %c0_i32_0 : i32, i32
  }
  func.func @transform_17(%arg0: i32) -> (i32, i32, i32) {
    %c0_i32 = arith.constant 0 : i32
    %c0_i32_0 = arith.constant 0 : i32
    %c0_i32_1 = arith.constant 0 : i32
    return %arg0, %c0_i32, %c0_i32_0 : i32, i32, i32
  }
}

</mosaic_0001>

<bundles_post_ra>
// kernel: tpu_custom_call.1
= control target key start
LH: loop header
LB: loop body
LE: loop exit
PB: predicated region body
PF: predicated region fallthrough
CT: control target
= control target key end

     0   :  { %s2318_s0 = inlined_call_operand.vmem [shape: f32[2,4,16], index: 0, kind: input, shape index: {}]   ;;  %s2319_s1 = inlined_call_operand.vmem [shape: f32[2,16,1], index: 1, kind: input, shape index: {}]   ;;  %s2320_s2 = inlined_call_operand.vmem [shape: f32[2,16,1], index: 2, kind: input, shape index: {}]   ;;  %s2321_s3 = inlined_call_operand.vmem [shape: f32[3,16,4], index: 3, kind: input, shape index: {}]   ;;  %s2322_s4 = inlined_call_operand.vmem [shape: f32[16,1], index: 4, kind: input, shape index: {}]   ;;  %s2323_s5 = inlined_call_operand.vmem [shape: f32[16,1], index: 5, kind: input, shape index: {}]   ;;  %s2324_s6 = inlined_call_operand.vmem [shape: f32[16,1], index: 6, kind: input, shape index: {}]   ;;  %s2325_s7 = inlined_call_operand.vmem [shape: f32[3,16,16], index: 7, kind: input, shape index: {}]   ;;  %s2326_s8 = inlined_call_operand.vmem [shape: f32[16,1], index: 8, kind: input, shape index: {}]   ;;  %s2327_s9 = inlined_call_operand.vmem [shape: f32[16,1], index: 9, kind: input, shape index: {}]   ;;  %s2328_s10 = inlined_call_operand.vmem [shape: f32[16,1], index: 10, kind: input, shape index: {}]   ;;  %s2329_s11 = inlined_call_operand.vmem [shape: f32[16,16], index: 11, kind: input, shape index: {}]   ;;  %s2330_s12 = inlined_call_operand.vmem [shape: f32[16,16], index: 12, kind: input, shape index: {}]   ;;  %s2331_s13 = inlined_call_operand.vmem [shape: f32[16,1], index: 13, kind: input, shape index: {}]   ;;  %s2332_s14 = inlined_call_operand.vmem [shape: f32[16,4], index: 14, kind: input, shape index: {}]   ;;  %s2333_s15 = inlined_call_operand.vmem [shape: f32[16,1], index: 15, kind: input, shape index: {}]   ;;  %s2334_s16 = inlined_call_operand.vmem [shape: f32[16,16], index: 16, kind: input, shape index: {}]   ;;  %s2335_s17 = inlined_call_operand.hbm [shape: f32[2,16,16], index: 17, kind: output, shape index: {}]  }
   0x1   :  { %2339 = sst [smem:[#allocation8_spill]] %s2318_s0 }
   0x2   :  { %2340 = sst [smem:[#allocation9_spill]] %s2319_s1 }
   0x3   :  { %2341 = sst [smem:[#allocation10_spill]] %s2320_s2 }
   0x4   :  { %2342 = sst [smem:[#allocation11_spill]] %s2321_s3 }
   0x5   :  { %22 = vsyncpa [#allocation3], 0 }
   0x6   :  { %24 = vsyncpa [#allocation3 + $0x1], 0  ;;  %s1944_s24 = smov 0   ;;  %s1946_s25 = smov 0  }
   0x7   :  { %s1948_s26 = smov 0   ;;  %s1950_s27 = smov 0  }
   0x8 LB: > { %2343 = sst [smem:[#allocation5_spill]] %s1843_s26  ;;  %s1965_s28 = sadd.s32 4294967295, %s1847_s27   ;;  %s1847_s27 = sphi %s1950_s27, %s2352_s27   ;;  %s1843_s26 = sphi %s1948_s26, %s2354_s26   ;;  %s1839_s25 = sphi %s1946_s25, %s2356_s25   ;;  %s1835_s24 = sphi %s1944_s24, %s2355_s24  }
   0x9   : > { %s1608_s29 = sadd.s32 4294967294, %s1847_s27   ;;  %s1969_s0 = sadd.s32 1, %s1847_s27  }
   0xa   : > { %2344 = sst [smem:[#allocation6_spill]] %s1969_s0  ;;  %s409_s30 = sadd.s32 1, %s1843_s26 }
   0xb   : > { %s406_s18 = ssub.s32 %s1847_s27, %s1969_s0  ;;  %p419_p0 = scmp.ne.s32.totalorder %s1843_s26, %s1839_s25 }
   0xc   : > { %p407_p1 = scmp.eq.s32.totalorder %s406_s18, 0  ;;  %p420_p2 = scmp.eq.s32.totalorder %s1965_s28, 1 }
   0xd   : > { %p425_p3 = scmp.ne.s32.totalorder %s1839_s25, %s1835_s24  ;;  %p426_p4 = scmp.eq.s32.totalorder %s1608_s29, 1 }
   0xe   : > { %s1980_s19 = scalar_select %p407_p1, %s1843_s26, %s409_s30  }
   0xf   : > { %p1982_p5 = por %p420_p2, %p419_p0  ;;  %p1986_p6 = por %p426_p4, %p425_p3 }
  0x10   : > { %2345 = sst [smem:[#allocation7_spill]] %s1980_s19  ;;  %p1611_p7 = scmp.ge.s32.totalorder %s1847_s27, 1 }
  0x11   : > { %p509_p8 = scmp.lt.s32.totalorder %s1847_s27, 3 }
  0x13   : > { %p510_p9 = pnand %p1611_p7, %p509_p8 }
  0x14   : > { %p570_p10 = scmp.lt.s32.totalorder (!%p510_p9), %s1965_s28, 1  ;;  %s2348_s30 = sld [smem:[#allocation8_spill]] (!%p510_p9) }
  0x15   : > { %513 = sbr.rel (%p510_p9) target bundleno = 2198 (0x896), region = 88  ;;  %s2349_s3 = sld [smem:[#allocation11_spill]] (!%p510_p9) }
  0x16   : > { %s2350_s2 = sld [smem:[#allocation10_spill]] (!%p510_p9) }
  0x17   : > { %s2351_s23 = sld [smem:[#allocation9_spill]] (!%p510_p9) }
  0x1a   : > { %v585_v0 = vlaneseq  ;;  %s1994_s21 = scalar_select %p570_p10, %s1965_s28, 1  ;;  %v1849_v8 = vmov 1.0   ;;  %vm604_vm2 = vcmask 130048   ;;  %vm660_vm5 = vcmask 1043456   ;;  %v603_v12 = vld [vmem:[%s2322_s4 + $0x8] sm:$0xff]  ;;  %v602_v14 = vld [vmem:[%s2322_s4] sm:$0xff] }
  0x1b   : > { %v1626_v10 = vld [vmem:[%s2349_s3 + $0x10] sm:$0xff]  ;;  %vm653_vm6 = vcmask 31744   ;;  %v1627_v11 = vld [vmem:[%s2349_s3 + $0x18] sm:$0xff]  ;;  %v1850_v13 = vmov 0   ;;  %v648_v15 = vld [vmem:[%s2349_s3] sm:$0xff]  ;;  %v1851_v37 = vmov 16.0  }
  0x1c   : > { %v586_v1 = vshrl.u32 %v585_v0, 7  ;;  %v1996_v3 = vand.u32 127, %v585_v0  ;;  %s1613_s22 = sshll.u32 %s1994_s21, 2  ;;  %1724 = vset.pattern.permute.xlu0 %v1850_v13  ;;  %1725 = vset.pattern.permute.xlu2 %v1850_v13  ;;  %v649_v17 = vld [vmem:[%s2349_s3 + $0x8] sm:$0xff]  ;;  %v1634_v18 = vld [vmem:[%s2349_s3 + $0x20] sm:$0xff]  ;;  %1727 = vrcp.f32 %v1851_v37 }
  0x1d   : > { %s573_s18 = scalar_lea.vmem %s2348_s30, %s1613_s22  ;;  %762 = vperm.xlu0 %1724, %v603_v12   ;;  %1726 = vset.pattern.permute.xlu1 %v1850_v13  ;;  %v1635_v20 = vld [vmem:[%s2349_s3 + $0x28] sm:$0xff]  ;;  %v2083_v48 = vld [vmem:[%s2334_s16] sm:$0xff]  ;;  %s1677_s22 = sshll.u32 %s1994_s21, 4 }
  0x1e   : > { %v587_v2 = vadd.s32 8, %v586_v1  ;;  %v1998_v4 = vadd.s32 1, %v586_v1  ;;  %v2012_v7 = vadd.s32 4294967295, %v586_v1  ;;  %v2018_v9 = vld [vmem:[%s573_s18] sm:$0xf]  ;;  %v2098_v49 = vld [vmem:[%s2334_s16 + $0x8] sm:$0xff]  ;;  %s2114_s29 = scalar_lea.vmem %s2350_s2, %s1677_s22  ;;  %s578_s19 = scalar_lea.vmem %s2351_s23, %s1677_s22 }
  0x1f   : > { %1628 = vmatpush.msk.msra.mxu2 %vm660_vm5, %v2018_v9  ;;  %v769_v52 = vld [vmem:[%s2324_s6] sm:$0xff]  ;;  %v768_v53 = vld [vmem:[%s2323_s5 + $0x8] sm:$0xff]  ;;  %s567_s22 = sand.u32 1, %s1839_s25  }
  0x20   : > { %v2001_v5 = vadd.s32 1, %v587_v2  ;;  %v2006_v6 = vadd.s32 4294967295, %v587_v2  ;;  %vm592_vm1 = vcmp.eq.s32.totalorder %v1996_v3, %v1998_v4  ;;  %vm598_vm4 = vcmp.eq.s32.totalorder %v1996_v3, %v2012_v7  ;;  %1629 = vmatmul.msk.f32.vlgmr.msra.gmra.mxu2 %vm653_vm6, %v1626_v10  ;;  %v1005_v54 = vld [vmem:[%s2114_s29 + $0x8] sm:$0xff]  ;;  %s1612_s30 = sshll.u32 %s567_s22, 4 }
  0x21   : > { %v1013_v55 = vand.u32 2147483647, %v1005_v54  ;;  %vm1009_vm9 = vcmp.ne.f32.partialorder %v1005_v54, %v1005_v54  ;;  %s569_s23 = scalar_lea.vmem [#allocation2], %s1612_s30 }
  0x22   : > { %vm593_vm0 = vcmp.eq.s32.totalorder %v1996_v3, %v2001_v5  ;;  %vm599_vm3 = vcmp.eq.s32.totalorder %v1996_v3, %v2006_v6  ;;  %v1728_v38 = vpop.eup %1727  ;;  %v1121_v6 = vld [vmem:[%s2326_s8 + $0x8] sm:$0xff] }
  0x23   : > { %1620 = vmatpush.msk.msra.mxu1 %vm593_vm0, %v1849_v8  ;;  %v778_v39 = vmul.f32 16.0, %v1728_v38  ;;  %vm782_vm7 = vweird.f32 %v1728_v38  ;;  %v1015_v56 = vsub.f32 0.0, %v1013_v55 }
  0x25   : > { %1621 = vmatpush.msk.msra.mxu1 %vm592_vm1, %v1849_v8  ;;  %757 = vperm.xlu0 %1724, %v602_v14   ;;  %v779_v40 = vsub.f32 1.0, %v778_v39  ;;  %v1018_v57 = vmul.f32 1.442695, %v1015_v56  ;;  %v1007_v14 = vmax.f32 %v1005_v54, 0.0 }
  0x26   : > { %1622 = vmatmul.msk.f32.vlgmr.msra.gmra.mxu1 %vm604_vm2, %v2018_v9 }
  0x27   : > { %1623 = vmatpush.msk.msrb.mxu1 %vm599_vm3, %v1849_v8  ;;  %v780_v41 = vmul.f32 %v1728_v38, %v779_v40  ;;  %1729 = vpow2.f32 %v1018_v57 }
  0x28   : > { %1630 = vmatmul.msk.f32.gmra.mxu2 %vm653_vm6, %v1627_v11 }
  0x29   : > { %1624 = vmatpush.msk.msrb.mxu1 %vm598_vm4, %v1849_v8  ;;  %v781_v42 = vadd.f32 %v1728_v38, %v780_v41 }
  0x2b   : > { %v2076_v43 = vsel %vm782_vm7, %v1728_v38, %v781_v42 }
  0x2d   : > { %v1730_v62 = vpop.eup %1729 }
  0x2e   : > { %1625 = vmatmul.msk.f32.vlgmr.msrb.gmra.mxu1 %vm604_vm2, %v2018_v9  ;;  %v1029_v0 = vadd.f32 1.0, %v1730_v62  ;;  %v1032_v1 = vmul.f32 -0.5, %v1730_v62  ;;  %v1035_v10 = vand.u32 2147483647, %v1730_v62 }
  0x30   : > { %1731 = vlog2.f32 %v1029_v0  ;;  %v1033_v5 = vadd.f32 1.0, %v1032_v1  ;;  %vm1036_vm8 = vcmp.lt.f32.partialorder %v1035_v10, 0.0004427343 }
  0x32   : > { %v1034_v12 = vmul.f32 %v1730_v62, %v1033_v5 }
  0x36   : > { %v1732_v13 = vpop.eup %1731 }
  0x8f   : > { %v763_v24 = vpop.permute.xlu0 %762 }
  0x97   : > { %v758_v34 = vpop.permute.xlu0 %757 }
  0xa3   : > { %v625_v16 = vpop.f32.mrf.mxu1  ;;  %v680_v21 = vpop.f32.mrf.mxu2 }
  0xa4   : > { %1631 = vmatpush.msk.msra.mxu3 %vm660_vm5, %v625_v16 }
  0xa5   : > { %1632 = vmatmul.msk.f32.vlgmr.msra.gmra.mxu3 %vm653_vm6, %v648_v15  ;;  %v1031_v15 = vmul.f32 0.6931472, %v1732_v13 }
  0xa7   : > { %v1037_v16 = vsel %vm1036_vm8, %v1034_v12, %v1031_v15 }
  0xab   : > { %v645_v19 = vpop.f32.mrf.mxu1  ;;  %v683_v25 = vpop.f32.mrf.mxu2 }
  0xac   : > { %1636 = vmatpush.msk.msra.mxu0 %vm660_vm5, %v645_v19  ;;  %v1120_v19 = vld [vmem:[%s2326_s8] sm:$0xff] }
  0xad   : > { %1633 = vmatmul.msk.f32.gmra.mxu3 %vm653_vm6, %v649_v17  ;;  %1637 = vmatmul.msk.f32.vlgmr.msra.gmra.mxu0 %vm653_vm6, %v1634_v18  ;;  %v1039_v17 = vadd.f32 %v1037_v16, %v1007_v14 }
  0xaf   : > { %v1041_v18 = vsel %vm1009_vm9, %v1005_v54, %v1039_v17 }
  0xb0   : > { %1733 = vtanh.f32 %v1041_v18  ;;  %v1002_v18 = vld [vmem:[%s2330_s12] sm:$0xff] }
  0xb5   : > { %1638 = vmatmul.msk.f32.gmra.mxu0 %vm653_vm6, %v1635_v20 }
  0xb6   : > { %v1734_v20 = vpop.eup %1733 }
 0x128   : > { %v712_v22 = vpop.f32.mrf.mxu3 }
 0x129   : > { %v713_v29 = vadd.f32 %v712_v22, %v680_v21  ;;  %v1045_v21 = vmul.f32 %v1734_v20, %v1005_v54  ;;  %v2131_v22 = vld [vmem:[%s2114_s29] sm:$0xff]  ;;  %s1679_s29 = sshll.u32 %s1965_s28, 4  ;;  %s1507_s28 = scalar_lea.sflag [#allocation3], %s567_s22 }
 0x12a   : > { %v747_v23 = vpop.f32.mrf.mxu0  ;;  %vm1008_vm11 = vcmp.ne.f32.partialorder %v2131_v22, %v2131_v22  ;;  %s1518_s0 = scalar_lea.hbm %s2335_s17, %s1679_s29 }
 0x12b   : > { %v753_v32 = vadd.f32 %v747_v23, %v713_v29  ;;  %1066 = vmatpush.msrb.mxu3 %v1045_v21  ;;  %v1012_v23 = vand.u32 2147483647, %v2131_v22  ;;  %s1521_s21 = sshll.u32 %s1518_s0, 4  ;;  %s1805_s0 = scalar_lea.hbm %s2335_s17, 32  ;;  %s1522_s21 = int_to_ptr.hbm [resolvable:$true] %s1521_s21 }
 0x12c   : > { %s1799_s29 = sshra.s32 %s1522_s21, 4  ;;  %s1800_s29 = int_to_ptr.hbm [resolvable:$true] %s1799_s29 }
 0x12d   : > { %v765_v35 = vadd.f32 %v758_v34, %v753_v32  ;;  %s1801_s18 = scalar_lea.hbm %s1800_s29, 16  ;;  %p1806_p0 = scmp.lt.s32.totalorder %s1800_s29, %s2335_s17 }
 0x12e   : > { %p1802_p11 = scmp.ne.s32.totalorder %s1800_s29, %s1801_s18  ;;  %p1807_p1 = scmp.lt.s32.totalorder %s1805_s0, %s1801_s18 }
 0x12f   : > { %v771_v36 = vsel %vm604_vm2, %v765_v35, 0.0 }
 0x130   : > { %v715_v26 = vpop.f32.mrf.mxu3  ;;  %p1803_p12 = pnand %p1802_p11, %p1982_p5  ;;  %p1808_p2 = por %p1807_p1, %p1806_p0 }
 0x131   : > { %v716_v27 = vadd.f32 %v715_v26, %v683_v25  ;;  %v2139_v25 = vld [vmem:[%s578_s19 + $0x8] sm:$0xff] }
 0x132   : > { %v750_v28 = vpop.f32.mrf.mxu0  ;;  %vm965_vm14 = vcmp.ne.f32.partialorder %v2139_v25, %v2139_v25  ;;  %p1804_p13 = pneg %p1803_p12 }
 0x133   : > { %v754_v30 = vadd.f32 %v750_v28, %v716_v27  ;;  %v969_v27 = vand.u32 2147483647, %v2139_v25  ;;  %v2142_v28 = vld [vmem:[%s578_s19] sm:$0xff]  ;;  %s1519_s19 = sshll.u32 %s569_s23, 4  ;;  %s1520_s19 = int_to_ptr.vmem [resolvable:$true] %s1519_s19 }
 0x134   : > { %vm964_vm15 = vcmp.ne.f32.partialorder %v2142_v28, %v2142_v28  ;;  %p1809_p3 = pnand %p1808_p2, %p1804_p13 }
 0x135   : > { %v766_v31 = vadd.f32 %v763_v24, %v754_v30  ;;  %v1014_v24 = vsub.f32 0.0, %v1012_v23  ;;  %v971_v29 = vsub.f32 0.0, %v969_v27  ;;  %v968_v30 = vand.u32 2147483647, %v2142_v28 }
 0x137   : > { %v774_v33 = vsel %vm604_vm2, %v766_v31, 0.0  ;;  %v1016_v26 = vmul.f32 1.442695, %v1014_v24  ;;  %v970_v32 = vsub.f32 0.0, %v968_v30  ;;  %v958_v24 = vld [vmem:[%s2329_s11] sm:$0xff] }
 0x138   : > { %775 = vadd.xlane.f32.xlu1 %v774_v33 }
 0x139   : > { %1735 = vpow2.f32 %v1016_v26  ;;  %v972_v33 = vmul.f32 1.442695, %v970_v32  ;;  %v959_v26 = vld [vmem:[%s2329_s11 + $0x8] sm:$0xff] }
 0x13f   : > { %v1736_v34 = vpop.eup %1735 }
 0x140   : > { %772 = vadd.xlane.f32.xlu1 %v771_v36  ;;  %v1023_v39 = vmul.f32 -0.5, %v1736_v34 }
 0x142   : > { %v1024_v41 = vadd.f32 1.0, %v1023_v39 }
 0x1ab   : > { %v776_v44 = vpop.xlane.xlu1 %775 }
 0x1ac   : > { %v785_v45 = vmul.f32 %v2076_v43, %v776_v44  ;;  %v1026_v44 = vand.u32 2147483647, %v1736_v34 }
 0x1ae   : > { %808 = vmatpush.msra.mxu1 %v785_v45  ;;  %vm1027_vm10 = vcmp.lt.f32.partialorder %v1026_v44, 0.0004427343 }
 0x1b3   : > { %v773_v46 = vpop.xlane.xlu1 %772 }
 0x1b4   : > { %v784_v47 = vmul.f32 %v2076_v43, %v773_v46  ;;  %v1025_v46 = vmul.f32 %v1736_v34, %v1024_v41 }
 0x1b6   : > { %809 = vmatpush.msra.mxu1 %v784_v47 }
 0x1b7   : > { %1639 = vmatmul.msk.f32.vlgmr.msra.gmra.mxu1 %vm604_vm2, %v2083_v48 }
 0x1b8   : > { %1647 = vmatpush.msk.msrb.mxu1 %vm593_vm0, %v1849_v8 }
 0x1ba   : > { %1648 = vmatpush.msk.msrb.mxu1 %vm592_vm1, %v1849_v8 }
 0x1bf   : > { %1640 = vmatmul.msk.f32.gmra.mxu1 %vm604_vm2, %v2098_v49 }
 0x234   : > { %v811_v50 = vpop.f32.mrf.mxu1 }
 0x23c   : > { %v814_v51 = vpop.f32.mrf.mxu1 }
 0x23d   : > { %824 = vperm.xlu2 %1725, %v814_v51  }
 0x245   : > { %819 = vperm.xlu2 %1725, %v811_v50   ;;  %v1006_v50 = vmax.f32 %v2131_v22, 0.0 }
 0x24d   : > { %908 = vperm.xlu2 %1725, %v769_v52  }
 0x255   : > { %901 = vperm.xlu2 %1725, %v768_v53  }
 0x297   : > { %v825_v58 = vpop.permute.xlu2 %824 }
 0x298   : > { %v2117_v59 = vsub.f32 %v766_v31, %v825_v58  ;;  %v974_v31 = vmul.f32 1.442695, %v971_v29 }
 0x29a   : > { %v830_v60 = vmul.f32 %v2117_v59, %v2117_v59  ;;  %1737 = vpow2.f32 %v974_v31 }
 0x29b   : > { %1739 = vpow2.f32 %v972_v33  ;;  %v1104_v33 = vld [vmem:[%s2331_s13] sm:$0xff] }
 0x29c   : > { %v834_v61 = vsel %vm604_vm2, %v830_v60, 0.0 }
 0x29d   : > { %835 = vadd.xlane.f32.xlu0 %v834_v61 }
 0x29f   : > { %v820_v63 = vpop.permute.xlu2 %819 }
 0x2a0   : > { %v2122_v2 = vsub.f32 %v765_v35, %v820_v63  ;;  %v1020_v35 = vadd.f32 1.0, %v1736_v34  ;;  %v1738_v36 = vpop.eup %1737  ;;  %v963_v63 = vmax.f32 %v2139_v25, 0.0 }
 0x2a1   : > { %v985_v37 = vadd.f32 1.0, %v1738_v36  ;;  %v1740_v38 = vpop.eup %1739  ;;  %v988_v47 = vmul.f32 -0.5, %v1738_v36  ;;  %v991_v56 = vand.u32 2147483647, %v1738_v36 }
 0x2a2   : > { %v829_v4 = vmul.f32 %v2122_v2, %v2122_v2  ;;  %1741 = vlog2.f32 %v1020_v35  ;;  %v976_v40 = vadd.f32 1.0, %v1740_v38  ;;  %v979_v53 = vmul.f32 -0.5, %v1740_v38 }
 0x2a3   : > { %1743 = vlog2.f32 %v985_v37  ;;  %v989_v52 = vadd.f32 1.0, %v988_v47  ;;  %vm992_vm12 = vcmp.lt.f32.partialorder %v991_v56, 0.0004427343  ;;  %v982_v0 = vand.u32 2147483647, %v1740_v38 }
 0x2a4   : > { %v831_v11 = vsel %vm604_vm2, %v829_v4, 0.0  ;;  %1745 = vlog2.f32 %v976_v40  ;;  %v980_v60 = vadd.f32 1.0, %v979_v53 }
 0x2a5   : > { %832 = vadd.xlane.f32.xlu1 %v831_v11  ;;  %v990_v58 = vmul.f32 %v1738_v36, %v989_v52  ;;  %v962_v11 = vmax.f32 %v2142_v28, 0.0  ;;  %vm983_vm13 = vcmp.lt.f32.partialorder %v982_v0, 0.0004427343 }
 0x2a6   : > { %v981_v5 = vmul.f32 %v1740_v38, %v980_v60 }
 0x2a8   : > { %v1742_v42 = vpop.eup %1741 }
 0x2a9   : > { %v1022_v45 = vmul.f32 0.6931472, %v1742_v42  ;;  %v1744_v54 = vpop.eup %1743 }
 0x2aa   : > { %v987_v57 = vmul.f32 0.6931472, %v1744_v54  ;;  %v1746_v61 = vpop.eup %1745  ;;  %v770_v54 = vld [vmem:[%s2324_s6 + $0x8] sm:$0xff] }
 0x2ab   : > { %v1028_v51 = vsel %vm1027_vm10, %v1025_v46, %v1022_v45  ;;  %v978_v4 = vmul.f32 0.6931472, %v1746_v61  ;;  %v909_v61 = vpop.permute.xlu2 %908 }
 0x2ac   : > { %v1038_v55 = vadd.f32 %v1028_v51, %v1006_v50  ;;  %v993_v1 = vsel %vm992_vm12, %v990_v58, %v987_v57  ;;  %v1105_v58 = vld [vmem:[%s2331_s13 + $0x8] sm:$0xff] }
 0x2ad   : > { %v995_v10 = vadd.f32 %v993_v1, %v963_v63  ;;  %v984_v12 = vsel %vm983_vm13, %v981_v5, %v978_v4 }
 0x2ae   : > { %v1040_v62 = vsel %vm1008_vm11, %v2131_v22, %v1038_v55  ;;  %v994_v14 = vadd.f32 %v984_v12, %v962_v11 }
 0x2af   : > { %1747 = vtanh.f32 %v1040_v62  ;;  %v997_v13 = vsel %vm965_vm14, %v2139_v25, %v995_v10 }
 0x2b0   : > { %1749 = vtanh.f32 %v997_v13  ;;  %v996_v15 = vsel %vm964_vm15, %v2142_v28, %v994_v14 }
 0x2b1   : > { %1273 = vperm.xlu0 %1724, %v1120_v19   ;;  %1751 = vtanh.f32 %v996_v15 }
 0x2b3   : > { %v902_v62 = vpop.permute.xlu2 %901 }
 0x2b5   : > { %v1748_v16 = vpop.eup %1747 }
 0x2b6   : > { %v1044_v17 = vmul.f32 %v1748_v16, %v2131_v22  ;;  %v1750_v19 = vpop.eup %1749  ;;  %v1003_v22 = vld [vmem:[%s2330_s12 + $0x8] sm:$0xff] }
 0x2b7   : > { %v1001_v20 = vmul.f32 %v1750_v19, %v2139_v25  ;;  %v1752_v21 = vpop.eup %1751  ;;  %v767_v25 = vld [vmem:[%s2323_s5] sm:$0xff] }
 0x2b8   : > { %1067 = vmatpush.msrb.mxu3 %v1044_v17  ;;  %v1000_v23 = vmul.f32 %v1752_v21, %v2142_v28 }
 0x2b9   : > { %1643 = vmatmul.msk.f32.vlgmr.msrb.gmra.mxu3 %vm604_vm2, %v1002_v18  ;;  %1095 = vmatpush.msrb.mxu0 %v1001_v20 }
 0x2bb   : > { %1096 = vmatpush.msrb.mxu0 %v1000_v23 }
 0x2bc   : > { %1645 = vmatmul.msk.f32.vlgmr.msrb.gmra.mxu0 %vm604_vm2, %v958_v24 }
 0x2be   : > { %896 = vperm.xlu1 %1726, %v767_v25  }
 0x2c1   : > { %1644 = vmatmul.msk.f32.gmra.mxu3 %vm604_vm2, %v1003_v22 }
 0x2c4   : > { %1646 = vmatmul.msk.f32.gmra.mxu0 %vm604_vm2, %v959_v26 }
 0x310   : > { %v836_v27 = vpop.xlane.xlu0 %835 }
 0x311   : > { %v838_v28 = vmul.f32 %v836_v27, %v2076_v43 }
 0x313   : > { %853 = vmatpush.msrb.mxu2 %v838_v28 }
 0x318   : > { %v833_v29 = vpop.xlane.xlu1 %832 }
 0x319   : > { %v837_v30 = vmul.f32 %v833_v29, %v2076_v43 }
 0x31b   : > { %854 = vmatpush.msrb.mxu2 %v837_v30 }
 0x31c   : > { %1641 = vmatmul.msk.f32.vlgmr.msrb.gmra.mxu2 %vm604_vm2, %v2083_v48 }
 0x31d   : > { %1651 = vmatpush.msk.msra.mxu2 %vm599_vm3, %v1849_v8 }
 0x31f   : > { %1652 = vmatpush.msk.msra.mxu2 %vm598_vm4, %v1849_v8 }
 0x324   : > { %1642 = vmatmul.msk.f32.gmra.mxu2 %vm604_vm2, %v2098_v49 }
 0x330   : > { %v897_v1 = vpop.permute.xlu1 %896 }
 0x339   : > { %v1098_v32 = vpop.f32.mrf.mxu0 }
 0x33c   : > { %v1069_v31 = vpop.f32.mrf.mxu3 }
 0x33d   : > { %v1099_v34 = vadd.f32 %v1098_v32, %v1069_v31 }
 0x33f   : > { %v1106_v35 = vadd.f32 %v1104_v33, %v1099_v34 }
 0x341   : > { %1110 = vperm.xlu1 %1726, %v1106_v35   ;;  %v1101_v56 = vpop.f32.mrf.mxu0 }
 0x344   : > { %v1072_v55 = vpop.f32.mrf.mxu3 }
 0x345   : > { %v1102_v57 = vadd.f32 %v1101_v56, %v1072_v55  ;;  %v1174_v55 = vld [vmem:[%s2325_s7] sm:$0xff] }
 0x347   : > { %v1107_v60 = vadd.f32 %v1105_v58, %v1102_v57  ;;  %v1661_v57 = vld [vmem:[%s2325_s7 + $0x20] sm:$0xff]  ;;  %v1175_v58 = vld [vmem:[%s2325_s7 + $0x8] sm:$0xff] }
 0x349   : > { %1278 = vperm.xlu1 %1726, %v1121_v6  }
 0x39f   : > { %v856_v36 = vpop.f32.mrf.mxu2 }
 0x3a0   : > { %v857_v3 = vadd.f32 1e-05, %v856_v36 }
 0x3a2   : > { %1753 = vrsqrt.f32 %v857_v3  ;;  %vm868_vm1 = vweird.f32 %v857_v3 }
 0x3a7   : > { %v859_v7 = vpop.f32.mrf.mxu2 }
 0x3a8   : > { %v1754_v8 = vpop.eup %1753  ;;  %v860_v37 = vadd.f32 1e-05, %v859_v7 }
 0x3a9   : > { %v863_v38 = vmul.f32 %v1754_v8, %v857_v3  ;;  %vm869_vm0 = vweird.f32 %v1754_v8 }
 0x3aa   : > { %1755 = vrsqrt.f32 %v860_v37  ;;  %vm870_vm3 = vmor %vm868_vm1, %vm869_vm0  ;;  %vm878_vm7 = vweird.f32 %v860_v37 }
 0x3ab   : > { %v864_v39 = vmul.f32 %v1754_v8, %v863_v38 }
 0x3ad   : > { %v865_v40 = vmul.f32 0.5, %v864_v39 }
 0x3af   : > { %v866_v41 = vsub.f32 1.5, %v865_v40 }
 0x3b0   : > { %v1756_v42 = vpop.eup %1755 }
 0x3b1   : > { %v873_v44 = vmul.f32 %v1756_v42, %v860_v37  ;;  %v867_v45 = vmul.f32 %v1754_v8, %v866_v41  ;;  %vm879_vm4 = vweird.f32 %v1756_v42 }
 0x3b2   : > { %vm880_vm8 = vmor %vm878_vm7, %vm879_vm4 }
 0x3b3   : > { %v874_v46 = vmul.f32 %v1756_v42, %v873_v44  ;;  %v871_v47 = vsel %vm870_vm3, %v1754_v8, %v867_v45  ;;  %v1111_v38 = vpop.permute.xlu1 %1110 }
 0x3b4   : > { %884 = vperm.xlu2 %1725, %v871_v47  }
 0x3b5   : > { %v875_v50 = vmul.f32 0.5, %v874_v46 }
 0x3b7   : > { %v876_v51 = vsub.f32 1.5, %v875_v50  ;;  %v1655_v50 = vld [vmem:[%s2325_s7 + $0x10] sm:$0xff] }
 0x3b9   : > { %v877_v52 = vmul.f32 %v1756_v42, %v876_v51  ;;  %v1656_v51 = vld [vmem:[%s2325_s7 + $0x18] sm:$0xff] }
 0x3bb   : > { %v881_v53 = vsel %vm880_vm8, %v1756_v42, %v877_v52 }
 0x3bc   : > { %889 = vperm.xlu2 %1725, %v881_v53  }
 0x3c4   : > { %913 = vperm.xlu2 %1725, %v770_v54  }
 0x3cc   : > { %1115 = vperm.xlu2 %1725, %v1107_v60   ;;  %v1662_v60 = vld [vmem:[%s2325_s7 + $0x28] sm:$0xff] }
 0x40e   : > { %v885_v63 = vpop.permute.xlu2 %884 }
 0x40f   : > { %v892_v0 = vmul.f32 %v885_v63, %v2122_v2 }
 0x411   : > { %v904_v4 = vmul.f32 %v897_v1, %v892_v0  ;;  %v1274_v0 = vpop.permute.xlu0 %1273 }
 0x413   : > { %v916_v5 = vadd.f32 %v909_v61, %v904_v4 }
 0x415   : > { %v924_v10 = vand.u32 2147483647, %v916_v5  ;;  %v918_v28 = vmax.f32 %v916_v5, 0.0  ;;  %vm920_vm10 = vcmp.ne.f32.partialorder %v916_v5, %v916_v5 }
 0x416   : > { %v890_v11 = vpop.permute.xlu2 %889 }
 0x417   : > { %v926_v12 = vsub.f32 0.0, %v924_v10  ;;  %v893_v14 = vmul.f32 %v890_v11, %v2117_v59 }
 0x419   : > { %v928_v13 = vmul.f32 1.442695, %v926_v12  ;;  %v905_v15 = vmul.f32 %v902_v62, %v893_v14 }
 0x41b   : > { %1757 = vpow2.f32 %v928_v13 }
 0x41e   : > { %v914_v16 = vpop.permute.xlu2 %913 }
 0x41f   : > { %v917_v17 = vadd.f32 %v914_v16, %v905_v15  ;;  %v1279_v15 = vpop.permute.xlu1 %1278 }
 0x421   : > { %v1758_v18 = vpop.eup %1757  ;;  %v925_v19 = vand.u32 2147483647, %v917_v17  ;;  %v919_v8 = vmax.f32 %v917_v17, 0.0  ;;  %vm921_vm12 = vcmp.ne.f32.partialorder %v917_v17, %v917_v17 }
 0x422   : > { %v932_v20 = vadd.f32 1.0, %v1758_v18  ;;  %v935_v21 = vmul.f32 -0.5, %v1758_v18  ;;  %v938_v22 = vand.u32 2147483647, %v1758_v18 }
 0x423   : > { %v927_v23 = vsub.f32 0.0, %v925_v19 }
 0x424   : > { %1759 = vlog2.f32 %v932_v20  ;;  %v936_v24 = vadd.f32 1.0, %v935_v21  ;;  %vm939_vm9 = vcmp.lt.f32.partialorder %v938_v22, 0.0004427343 }
 0x425   : > { %v930_v2 = vmul.f32 1.442695, %v927_v23 }
 0x426   : > { %v937_v27 = vmul.f32 %v1758_v18, %v936_v24  ;;  %v1116_v46 = vpop.permute.xlu2 %1115  ;;  %v1283_v18 = vld [vmem:[%s2327_s9] sm:$0xff] }
 0x427   : > { %1761 = vpow2.f32 %v930_v2 }
 0x42a   : > { %v1760_v26 = vpop.eup %1759 }
 0x42b   : > { %v934_v25 = vmul.f32 0.6931472, %v1760_v26 }
 0x42d   : > { %v1762_v59 = vpop.eup %1761  ;;  %v940_v29 = vsel %vm939_vm9, %v937_v27, %v934_v25 }
 0x42e   : > { %v950_v30 = vadd.f32 %v940_v29, %v918_v28  ;;  %v941_v31 = vadd.f32 1.0, %v1762_v59  ;;  %v944_v32 = vmul.f32 -0.5, %v1762_v59  ;;  %v947_v35 = vand.u32 2147483647, %v1762_v59 }
 0x430   : > { %v952_v33 = vsel %vm920_vm10, %v916_v5, %v950_v30  ;;  %1763 = vlog2.f32 %v941_v31  ;;  %v945_v34 = vadd.f32 1.0, %v944_v32  ;;  %vm948_vm11 = vcmp.lt.f32.partialorder %v947_v35, 0.0004427343  ;;  %v1284_v31 = vld [vmem:[%s2327_s9 + $0x8] sm:$0xff] }
 0x431   : > { %1765 = vtanh.f32 %v952_v33 }
 0x432   : > { %v946_v7 = vmul.f32 %v1762_v59, %v945_v34 }
 0x436   : > { %v1764_v6 = vpop.eup %1763 }
 0x437   : > { %v1766_v36 = vpop.eup %1765  ;;  %v943_v3 = vmul.f32 0.6931472, %v1764_v6  ;;  %v1459_v6 = vld [vmem:[%s2332_s14] sm:$0xff] }
 0x438   : > { %v956_v37 = vmul.f32 %v1766_v36, %v916_v5  ;;  %v1460_v36 = vld [vmem:[%s2332_s14 + $0x8] sm:$0xff] }
 0x439   : > { %v949_v39 = vsel %vm948_vm11, %v946_v7, %v943_v3 }
 0x43a   : > { %v951_v40 = vadd.f32 %v949_v39, %v919_v8  ;;  %v1118_v41 = vadd.f32 %v1111_v38, %v956_v37 }
 0x43c   : > { %v953_v42 = vsel %vm921_vm12, %v917_v17, %v951_v40  ;;  %1649 = vmatmul.msk.f32.vlgmr.msrb.gmra.mxu1 %vm604_vm2, %v1118_v41  ;;  %1653 = vmatmul.msk.f32.vlgmr.msra.gmra.mxu2 %vm604_vm2, %v1118_v41 }
 0x43d   : > { %1767 = vtanh.f32 %v953_v42 }
 0x443   : > { %v1768_v44 = vpop.eup %1767 }
 0x444   : > { %v957_v45 = vmul.f32 %v1768_v44, %v917_v17 }
 0x446   : > { %v1119_v47 = vadd.f32 %v1116_v46, %v957_v45 }
 0x448   : > { %1650 = vmatmul.msk.f32.gmra.mxu1 %vm604_vm2, %v1119_v47  ;;  %1654 = vmatmul.msk.f32.gmra.mxu2 %vm604_vm2, %v1119_v47 }
 0x449   : > { %1199 = vmatpush.msra.mxu3 %v1119_v47 }
 0x44b   : > { %1200 = vmatpush.msra.mxu3 %v1118_v41 }
 0x44c   : > { %1657 = vmatmul.msk.f32.vlgmr.msra.gmra.mxu3 %vm604_vm2, %v1655_v50 }
 0x454   : > { %1658 = vmatmul.msk.f32.gmra.mxu3 %vm604_vm2, %v1656_v51  ;;  %v1286_v51 = vld [vmem:[%s2328_s10 + $0x8] sm:$0xff] }
 0x4b9   : > { %v1145_v52 = vpop.f32.mrf.mxu1 }
 0x4bf   : > { %v1168_v53 = vpop.f32.mrf.mxu2 }
 0x4c5   : > { %v1148_v54 = vpop.f32.mrf.mxu1 }
 0x4c6   : > { %1228 = vmatpush.msra.mxu0 %v1148_v54  ;;  %v1462_v54 = vld [vmem:[%s2333_s15 + $0x8] sm:$0xff] }
 0x4c8   : > { %1229 = vmatpush.msra.mxu0 %v1145_v52 }
 0x4c9   : > { %1659 = vmatmul.msk.f32.vlgmr.msra.gmra.mxu0 %vm604_vm2, %v1174_v55  ;;  %v1461_v55 = vld [vmem:[%s2333_s15] sm:$0xff] }
 0x4ca   : > { %1669 = vmatpush.msk.msrb.mxu0 %vm660_vm5, %v2018_v9 }
 0x4cb   : > { %v1171_v56 = vpop.f32.mrf.mxu2 }
 0x4cc   : > { %1260 = vmatpush.msra.mxu1 %v1171_v56 }
 0x4ce   : > { %1261 = vmatpush.msra.mxu1 %v1168_v53  ;;  %v1285_v53 = vld [vmem:[%s2328_s10] sm:$0xff] }
 0x4cf   : > { %1663 = vmatmul.msk.f32.vlgmr.msra.gmra.mxu1 %vm604_vm2, %v1661_v57  ;;  %v1202_v9 = vpop.f32.mrf.mxu3 }
 0x4d1   : > { %1660 = vmatmul.msk.f32.gmra.mxu0 %vm604_vm2, %v1175_v58 }
 0x4d7   : > { %1664 = vmatmul.msk.f32.gmra.mxu1 %vm604_vm2, %v1662_v60  ;;  %v1205_v4 = vpop.f32.mrf.mxu3 }
 0x4d9   : > { %1670 = vmatmul.msk.f32.vlgmr.msrb.gmra.mxu0 %vm653_vm6, %v1459_v6 }
 0x4e1   : > { %1671 = vmatmul.msk.f32.gmra.mxu0 %vm653_vm6, %v1460_v36 }
 0x546   : > { %v1231_v61 = vpop.f32.mrf.mxu0 }
 0x547   : > { %v1232_v62 = vadd.f32 %v1231_v61, %v1202_v9 }
 0x54c   : > { %v1263_v63 = vpop.f32.mrf.mxu1 }
 0x54d   : > { %v1269_v1 = vadd.f32 %v1263_v63, %v1232_v62 }
 0x54e   : > { %v1234_v5 = vpop.f32.mrf.mxu0 }
 0x54f   : > { %v1281_v10 = vadd.f32 %v1274_v0, %v1269_v1  ;;  %v1235_v11 = vadd.f32 %v1234_v5, %v1205_v4 }
 0x551   : > { %v1287_v12 = vsel %vm604_vm2, %v1281_v10, 0.0 }
 0x552   : > { %1288 = vadd.xlane.f32.xlu1 %v1287_v12 }
 0x554   : > { %v1266_v13 = vpop.f32.mrf.mxu1 }
 0x555   : > { %v1270_v14 = vadd.f32 %v1266_v13, %v1235_v11 }
 0x557   : > { %v1282_v16 = vadd.f32 %v1279_v15, %v1270_v14 }
 0x559   : > { %v1290_v17 = vsel %vm604_vm2, %v1282_v16, 0.0 }
 0x55a   : > { %1291 = vadd.xlane.f32.xlu2 %v1290_v17 }
 0x56b   : > { %1397 = vperm.xlu1 %1726, %v1283_v18  }
 0x5c5   : > { %v1289_v19 = vpop.xlane.xlu1 %1288 }
 0x5c6   : > { %v1293_v23 = vmul.f32 %v1289_v19, %v2076_v43 }
 0x5cd   : > { %v1292_v20 = vpop.xlane.xlu2 %1291 }
 0x5ce   : > { %v1294_v21 = vmul.f32 %v1292_v20, %v2076_v43 }
 0x5d0   : > { %1309 = vmatpush.msrb.mxu2 %v1294_v21 }
 0x5d2   : > { %1310 = vmatpush.msrb.mxu2 %v1293_v23 }
 0x5d3   : > { %1665 = vmatmul.msk.f32.vlgmr.msrb.gmra.mxu2 %vm604_vm2, %v2083_v48 }
 0x5db   : > { %1666 = vmatmul.msk.f32.gmra.mxu2 %vm604_vm2, %v2098_v49 }
 0x5dd   : > { %v1398_v56 = vpop.permute.xlu1 %1397 }
 0x656   : > { %v1312_v2 = vpop.f32.mrf.mxu2 }
 0x65e   : > { %v1315_v24 = vpop.f32.mrf.mxu2 }
 0x65f   : > { %1325 = vperm.xlu0 %1724, %v1315_v24  }
 0x667   : > { %1320 = vperm.xlu0 %1724, %v1312_v2  }
 0x6d1   : > { %v1326_v22 = vpop.permute.xlu0 %1325 }
 0x6d2   : > { %v2248_v26 = vsub.f32 %v1282_v16, %v1326_v22 }
 0x6d4   : > { %v1331_v25 = vmul.f32 %v2248_v26, %v2248_v26 }
 0x6d6   : > { %v1335_v27 = vsel %vm604_vm2, %v1331_v25, 0.0 }
 0x6d7   : > { %1336 = vadd.xlane.f32.xlu0 %v1335_v27 }
 0x6d9   : > { %v1321_v28 = vpop.permute.xlu0 %1320 }
 0x6da   : > { %v1328_v59 = vsub.f32 %v1281_v10, %v1321_v28 }
 0x6dc   : > { %v1330_v29 = vmul.f32 %v1328_v59, %v1328_v59 }
 0x6de   : > { %v1332_v30 = vsel %vm604_vm2, %v1330_v29, 0.0 }
 0x6df   : > { %1333 = vadd.xlane.f32.xlu2 %v1332_v30 }
 0x6eb   : > { %1402 = vperm.xlu0 %1724, %v1284_v31  }
 0x74a   : > { %v1337_v32 = vpop.xlane.xlu0 %1336 }
 0x74b   : > { %v1339_v33 = vmul.f32 %v1337_v32, %v2076_v43 }
 0x74d   : > { %1354 = vmatpush.msrb.mxu3 %v1339_v33 }
 0x752   : > { %v1334_v34 = vpop.xlane.xlu2 %1333 }
 0x753   : > { %v1338_v35 = vmul.f32 %v1334_v34, %v2076_v43 }
 0x755   : > { %1355 = vmatpush.msrb.mxu3 %v1338_v35  ;;  %v1496_v35 = vpop.f32.mrf.mxu0 }
 0x756   : > { %1667 = vmatmul.msk.f32.vlgmr.msrb.gmra.mxu3 %vm604_vm2, %v2083_v48 }
 0x75d   : > { %v1403_v0 = vpop.permute.xlu0 %1402 }
 0x75e   : > { %1668 = vmatmul.msk.f32.gmra.mxu3 %vm604_vm2, %v2098_v49 }
 0x7d9   : > { %v1357_v43 = vpop.f32.mrf.mxu3 }
 0x7da   : > { %v1358_v3 = vadd.f32 1e-05, %v1357_v43 }
 0x7dc   : > { %1769 = vrsqrt.f32 %v1358_v3  ;;  %vm1369_vm13 = vweird.f32 %v1358_v3 }
 0x7e1   : > { %v1360_v7 = vpop.f32.mrf.mxu3 }
 0x7e2   : > { %v1770_v48 = vpop.eup %1769  ;;  %v1361_v8 = vadd.f32 1e-05, %v1360_v7 }
 0x7e3   : > { %v1364_v37 = vmul.f32 %v1770_v48, %v1358_v3  ;;  %vm1370_vm5 = vweird.f32 %v1770_v48 }
 0x7e4   : > { %1771 = vrsqrt.f32 %v1361_v8  ;;  %vm1371_vm14 = vmor %vm1369_vm13, %vm1370_vm5  ;;  %vm1379_vm6 = vweird.f32 %v1361_v8 }
 0x7e5   : > { %v1365_v49 = vmul.f32 %v1770_v48, %v1364_v37  ;;  %v1499_v37 = vpop.f32.mrf.mxu0 }
 0x7e7   : > { %v1366_v38 = vmul.f32 0.5, %v1365_v49 }
 0x7e9   : > { %v1367_v39 = vsub.f32 1.5, %v1366_v38 }
 0x7ea   : > { %v1772_v40 = vpop.eup %1771 }
 0x7eb   : > { %v1374_v41 = vmul.f32 %v1772_v40, %v1361_v8  ;;  %v1368_v42 = vmul.f32 %v1770_v48, %v1367_v39  ;;  %vm1380_vm15 = vweird.f32 %v1772_v40 }
 0x7ec   : > { %vm1381_vm0 = vmor %vm1379_vm6, %vm1380_vm15 }
 0x7ed   : > { %v1375_v44 = vmul.f32 %v1772_v40, %v1374_v41  ;;  %v1372_v45 = vsel %vm1371_vm14, %v1770_v48, %v1368_v42 }
 0x7ee   : > { %1385 = vperm.xlu1 %1726, %v1372_v45  }
 0x7ef   : > { %v1376_v46 = vmul.f32 0.5, %v1375_v44 }
 0x7f1   : > { %v1377_v47 = vsub.f32 1.5, %v1376_v46 }
 0x7f3   : > { %v1378_v50 = vmul.f32 %v1772_v40, %v1377_v47 }
 0x7f5   : > { %v1382_v52 = vsel %vm1381_vm0, %v1772_v40, %v1378_v50 }
 0x7f6   : > { %1390 = vperm.xlu2 %1725, %v1382_v52   ;;  %1414 = vperm.xlu1 %1726, %v1286_v51  }
 0x7fe   : > { %1409 = vperm.xlu2 %1725, %v1285_v53   ;;  %1470 = vperm.xlu1 %1726, %v1462_v54  }
 0x806   : > { %1465 = vperm.xlu2 %1725, %v1461_v55  }
 0x850   : > { %v1391_v57 = vpop.permute.xlu2 %1390 }
 0x851   : > { %v1394_v9 = vmul.f32 %v1391_v57, %v2248_v26 }
 0x853   : > { %v1406_v4 = vmul.f32 %v1403_v0, %v1394_v9 }
 0x858   : > { %v1410_v62 = vpop.permute.xlu2 %1409 }
 0x860   : > { %v1386_v58 = vpop.permute.xlu1 %1385  ;;  %v1466_v3 = vpop.permute.xlu2 %1465 }
 0x861   : > { %v1393_v60 = vmul.f32 %v1386_v58, %v1328_v59  ;;  %v1497_v48 = vadd.f32 %v1496_v35, %v1466_v3 }
 0x863   : > { %v1405_v61 = vmul.f32 %v1398_v56, %v1393_v60 }
 0x865   : > { %v1417_v63 = vadd.f32 %v1410_v62, %v1405_v61 }
 0x867   : > { %v1425_v1 = vand.u32 2147483647, %v1417_v63  ;;  %v1419_v27 = vmax.f32 %v1417_v63, 0.0  ;;  %vm1421_vm3 = vcmp.ne.f32.partialorder %v1417_v63, %v1417_v63 }
 0x868   : > { %v1415_v5 = vpop.permute.xlu1 %1414 }
 0x869   : > { %v1427_v10 = vsub.f32 0.0, %v1425_v1  ;;  %v1418_v11 = vadd.f32 %v1415_v5, %v1406_v4 }
 0x86b   : > { %v1429_v12 = vmul.f32 1.442695, %v1427_v10  ;;  %v1426_v13 = vand.u32 2147483647, %v1418_v11  ;;  %v1420_v34 = vmax.f32 %v1418_v11, 0.0  ;;  %vm1422_vm7 = vcmp.ne.f32.partialorder %v1418_v11, %v1418_v11 }
 0x86d   : > { %1773 = vpow2.f32 %v1429_v12  ;;  %v1428_v14 = vsub.f32 0.0, %v1426_v13 }
 0x86f   : > { %v1431_v15 = vmul.f32 1.442695, %v1428_v14 }
 0x870   : > { %v1471_v49 = vpop.permute.xlu1 %1470 }
 0x871   : > { %1775 = vpow2.f32 %v1431_v15  ;;  %v1500_v41 = vadd.f32 %v1499_v37, %v1471_v49 }
 0x873   : > { %v1774_v16 = vpop.eup %1773 }
 0x874   : > { %v1433_v17 = vadd.f32 1.0, %v1774_v16  ;;  %v1436_v18 = vmul.f32 -0.5, %v1774_v16  ;;  %v1439_v2 = vand.u32 2147483647, %v1774_v16 }
 0x876   : > { %1777 = vlog2.f32 %v1433_v17  ;;  %v1437_v21 = vadd.f32 1.0, %v1436_v18  ;;  %vm1440_vm1 = vcmp.lt.f32.partialorder %v1439_v2, 0.0004427343 }
 0x877   : > { %v1776_v19 = vpop.eup %1775 }
 0x878   : > { %v1442_v20 = vadd.f32 1.0, %v1776_v19  ;;  %v1445_v23 = vmul.f32 -0.5, %v1776_v19  ;;  %v1438_v26 = vmul.f32 %v1774_v16, %v1437_v21  ;;  %v1448_v28 = vand.u32 2147483647, %v1776_v19 }
 0x87a   : > { %1779 = vlog2.f32 %v1442_v20  ;;  %v1446_v25 = vadd.f32 1.0, %v1445_v23  ;;  %vm1449_vm4 = vcmp.lt.f32.partialorder %v1448_v28, 0.0004427343 }
 0x87c   : > { %v1778_v24 = vpop.eup %1777  ;;  %v1447_v32 = vmul.f32 %v1776_v19, %v1446_v25 }
 0x87d   : > { %v1435_v22 = vmul.f32 0.6931472, %v1778_v24 }
 0x87f   : > { %v1441_v59 = vsel %vm1440_vm1, %v1438_v26, %v1435_v22 }
 0x880   : > { %v1780_v29 = vpop.eup %1779  ;;  %v1451_v30 = vadd.f32 %v1441_v59, %v1419_v27 }
 0x881   : > { %v1444_v31 = vmul.f32 0.6931472, %v1780_v29 }
 0x882   : > { %v1453_v33 = vsel %vm1421_vm3, %v1417_v63, %v1451_v30 }
 0x883   : > { %1781 = vtanh.f32 %v1453_v33  ;;  %v1450_v6 = vsel %vm1449_vm4, %v1447_v32, %v1444_v31 }
 0x884   : > { %v1452_v36 = vadd.f32 %v1450_v6, %v1420_v34 }
 0x886   : > { %v1454_v43 = vsel %vm1422_vm7, %v1418_v11, %v1452_v36 }
 0x887   : > { %1783 = vtanh.f32 %v1454_v43 }
 0x889   : > { %v1782_v7 = vpop.eup %1781 }
 0x88a   : > { %v1457_v8 = vmul.f32 %v1782_v7, %v1417_v63 }
 0x88c   : > { %v1502_v38 = vadd.f32 %v1497_v48, %v1457_v8 }
 0x88d   : > { %v1784_v39 = vpop.eup %1783 }
 0x88e   : > { %v1458_v40 = vmul.f32 %v1784_v39, %v1418_v11  ;;  %1504 = vst.msk [vmem:[%s569_s23] sm:$0xff] %vm604_vm2, %v1502_v38 }
 0x890   : > { %v1503_v42 = vadd.f32 %v1500_v41, %v1458_v40 }
 0x892   : > { %1505 = vst.msk [vmem:[%s569_s23 + $0x8] sm:$0xff] %vm604_vm2, %v1503_v42 }
 0x893   : > { %1812 = shalt.err (!%p1809_p3)
}
 0x894   : > { %s1852_s22 = smov 128   ;;  %s1853_s23 = smov 8  }
 0x895   : > { %1680 = dma.vmem_to_hbm [thread:$0]  (%p1982_p5), %s1520_s19, 256, %s1522_s21, %s1507_s28, %s1852_s22, %s1852_s22, %s1853_s23  }
 0x896 PF: > { %p1686_p4 = scmp.ge.s32.totalorder %s1847_s27, 2  ;;  %s1536_s30 = sand.u32 1, %s1835_s24  }
 0x897   : > { %s1537_s2 = scalar_lea.sflag [#allocation3], %s1536_s30 }
 0x898   : > { %p1683_p7 = pnand %p1686_p4, %p1986_p6 }
 0x89a   : > { %p1684_p8 = pneg %p1683_p7 }
 0x89c   : > { %1830 = dma.done.wait (%p1684_p8), %s1537_s2, 256  }
 0x89d   : > { %1832 = vsyncadd (%p1684_p8), %s1537_s2, 4294967040  ;;  %s2352_s27 = sld [smem:[#allocation6_spill]]  ;;  %s2355_s24 = smov %s1839_s25 }
 0x89e   : > { %s2353_s3 = sld [smem:[#allocation5_spill]] }
 0x89f   : > { %s2354_s26 = sld [smem:[#allocation7_spill]] }
 0x8a3   : > { %p27_p9 = scmp.ge.s32.totalorder %s2352_s27, 4  }
 0x8a4   : > { %s2356_s25 = smov %s2353_s3 }
 0x8a5   :  { %29 = sbr.rel (!%p27_p9) target bundleno = 8 (0x8), region = 133 }
 0x8aa   :  { %1543 = vsyncpa [#allocation3], 1 }
 0x8ab   :  { %1545 = vsyncpa [#allocation3 + $0x1], 1 }

</bundles_post_ra>
